<compile_context>
chip_gen: v7x
topology: tpu7x:2x2x1
jax: 0.10.0
libtpu: 0.0.40
codegen_flags: <defaults>
</compile_context>

<pallas_src>
import functools

import jax
import jax.numpy as jnp
from jax.experimental import pallas as pl
from jax.experimental.pallas import tpu as pltpu

IN_CH = 3
NUM_CLASSES = 10
MAX_BLOCK_BATCH = 64          # per-step sample batch cap (VMEM ~9 MiB @ 64)


# ----------------------------------------------------------------------------
# Fused forward kernel: one grid step processes `bsz` samples
# ----------------------------------------------------------------------------

def _resnet_kernel(xs_ref, ws_ref, bs_ref, w1a_ref, b1a_ref, w1b_ref, b1b_ref,
                   w2m_ref, b2m_ref, w2b_ref, b2b_ref, wfc_ref, bfc_ref,
                   out_ref, pa_ref, pb_ref, pc_ref):
    f32 = jnp.float32
    bf16 = jnp.bfloat16
    bsz = xs_ref.shape[0]

    # Zero only the pad *rings* (interiors are fully rewritten every step; the
    # W-direction padding is folded into the banded weights, so only the
    # top/bottom pad rows must be zero).  Done every iteration so it stays
    # correct under megacore "parallel" sharding.
    zrow = jnp.zeros((bsz, 1, 128), f32)
    pa_ref[:, 0:1, :] = zrow
    pa_ref[:, 9:10, :] = zrow
    pb_ref[:, 0:1, :] = zrow
    pb_ref[:, 9:10, :] = zrow
    pc_ref[:, 0:1, :] = zrow
    pc_ref[:, 5:6, :] = zrow

    # ---- stem conv 7x7/s2 (+folded BN) + ReLU: ONE lane-dense banded GEMM --
    # xs rows are ordered (sample, h-phase, w-phase, h2); the banded weight
    # produces all 8 w2 positions side by side -> output lanes = w2*16 + c.
    xs = xs_ref[...].reshape(bsz * 32, 735)                        # bf16
    stem = jnp.dot(xs, ws_ref[...], preferred_element_type=f32)    # (32B,128)
    stem = jnp.maximum(stem + bs_ref[...], 0.0)                    # ReLU
    phases = stem.reshape(bsz, 2, 2, 8, 128)      # [b, hp, wp, h2, w2*16+c]
    p00 = phases[:, 0, 0]
    p01 = phases[:, 0, 1]
    p10 = phases[:, 1, 0]
    p11 = phases[:, 1, 1]

    # ---- maxpool 3x3/s2/p1: pure VPU/XLU (no one-hot matmuls) --------------
    # zero padding == -inf padding because the stem output is post-ReLU (>=0).
    lane = jax.lax.broadcasted_iota(jnp.int32, (bsz, 8, 128), 2)

    def at_wm1(x):            # value at (w2 - 1); zero where w2 == 0
        r = pltpu.roll(x, shift=16, axis=2)       # XLU lane shift by C lanes
        return jnp.where(lane >= 16, r, 0.0)

    def at_hm1(x):            # value at (h2 - 1); zero row where h2 == 0
        return jnp.concatenate(
            [jnp.zeros((bsz, 1, 128), f32), x[:, :7, :]], axis=1)

    cm0 = jnp.maximum(jnp.maximum(p00, p01), at_wm1(p01))     # stem row 2i
    cm1 = jnp.maximum(jnp.maximum(p10, p11), at_wm1(p11))     # stem row 2i+1
    mp = jnp.maximum(jnp.maximum(cm0, cm1), at_hm1(cm1))      # (B,8,128)

    # ---- basic block 1: two 3x3/s1 convs (banded GEMMs), identity shortcut -
    pa_ref[:, 1:9, :] = mp

    def conv3x3(src_ref, w_ref, b_ref, rows):
        # banded conv: concat the 3 kh row-slabs along lanes -> one GEMM
        a = jnp.concatenate(
            [src_ref[:, kh:kh + rows, :] for kh in range(3)], axis=-1)
        a = a.reshape(bsz * rows, 3 * 128).astype(bf16)
        return jnp.dot(a, w_ref[...], preferred_element_type=f32) + b_ref[...]

    h1 = jnp.maximum(conv3x3(pa_ref, w1a_ref, b1a_ref, 8), 0.0)    # (8B,128)
    pb_ref[:, 1:9, :] = h1.reshape(bsz, 8, 128)
    h2 = conv3x3(pb_ref, w1b_ref, b1b_ref, 8).reshape(bsz, 8, 128) + mp
    h2 = jnp.maximum(h2, 0.0)
    pa_ref[:, 1:9, :] = h2            # reuse pa as the block-1 output buffer

    # ---- basic block 2: 3x3/s2 conv (16->32) merged with 1x1/s2 projection -
    # stride-2 row selection via strided sublane slices (no one-hot matmuls);
    # conv1 and projection share the LHS -> one GEMM with N = 256.
    a2 = jnp.concatenate(
        [pa_ref[:, pl.ds(kh, 4, stride=2), :] for kh in range(3)], axis=-1)
    a2 = a2.reshape(bsz * 4, 3 * 128).astype(bf16)
    y = jnp.dot(a2, w2m_ref[...], preferred_element_type=f32) + b2m_ref[...]
    c1 = jnp.maximum(y[:, :128], 0.0)            # conv1 + BN + ReLU (4x4x32)
    shortcut = y[:, 128:]                        # projection (+BN), no ReLU
    pc_ref[:, 1:5, :] = c1.reshape(bsz, 4, 128)

    # ---- block 2 conv2 3x3/s1 (32->32) + shortcut + ReLU -------------------
    z = conv3x3(pc_ref, w2b_ref, b2b_ref, 4) + shortcut
    z = jnp.maximum(z, 0.0)                      # (4B,128) = 4x4x32 packed

    # ---- global average pool + FC (pool/scale folded into the FC weight) ---
    zsum = jnp.sum(z.reshape(bsz, 4, 128), axis=1)                 # (B,128)
    logits = jnp.dot(zsum.astype(bf16), wfc_ref[...],
                     preferred_element_type=f32) + bfc_ref[...]    # (B,128)
    out_ref[:, 0, :] = logits


# ----------------------------------------------------------------------------
# Parameter init: BN folded, banded (lane-packed) bf16 weight matrices
# ----------------------------------------------------------------------------

def init_resnet_params(key, num_classes=NUM_CLASSES):
    ks = jax.random.split(key, 14)

    def conv_w(k, kh, kw, ic, oc):
        fan_in = kh * kw * ic
        return (jax.random.normal(k, (kh, kw, ic, oc), jnp.float32)
                * (2.0 / fan_in) ** 0.5)

    def bn_fold(k, c, eps=1e-5):
        k1, k2, k3, k4 = jax.random.split(k, 4)
        gamma = 1.0 + 0.1 * jax.random.normal(k1, (c,), jnp.float32)
        beta = 0.1 * jax.random.normal(k2, (c,), jnp.float32)
        mean = 0.1 * jax.random.normal(k3, (c,), jnp.float32)
        var = jnp.abs(jax.random.normal(k4, (c,), jnp.float32)) + 0.5
        scale = gamma / jnp.sqrt(var + eps)
        return scale, beta - mean * scale

    def banded_s1(w, width, cin, cout):
        # 3x3/s1 conv on a (width*cin)-lane-packed row -> (3*width*cin, width*cout)
        m = jnp.zeros((3, width, cin, width, cout), jnp.float32)
        for kw in range(3):
            for wo in range(width):
                wi = wo + kw - 1
                if 0 <= wi < width:
                    m = m.at[:, wi, :, wo, :].set(w[:, kw])
        return m.reshape(3 * width * cin, width * cout)

    def banded_s2_merged(w, wproj, win, wout, cin, cout):
        # 3x3/s2 conv + 1x1/s2 projection, output channels concatenated
        m = jnp.zeros((3, win, cin, wout, cout), jnp.float32)
        for kw in range(3):
            for jo in range(wout):
                wi = 2 * jo + kw - 1
                if 0 <= wi < win:
                    m = m.at[:, wi, :, jo, :].set(w[:, kw])
        mpj = jnp.zeros((3, win, cin, wout, cout), jnp.float32)
        for jo in range(wout):
            mpj = mpj.at[1, 2 * jo, :, jo, :].set(wproj)
        k = 3 * win * cin
        return jnp.concatenate(
            [m.reshape(k, wout * cout), mpj.reshape(k, wout * cout)], axis=1)

    p = {}

    # stem 7x7/s2, 3->16: banded (735, 128); output lane = w2*16 + c
    w = conv_w(ks[0], 7, 7, IN_CH, 16)
    s, b = bn_fold(ks[1], 16)
    w = w * s
    wb = jnp.zeros((7, 35, IN_CH, 8, 16), jnp.float32)
    for w2 in range(8):
        wb = wb.at[:, 4 * w2:4 * w2 + 7, :, w2, :].set(w)
    p['w_stem'] = wb.reshape(735, 128).astype(jnp.bfloat16)
    p['b_stem'] = jnp.tile(b, 8).reshape(1, 128)

    # basic block 1: two 3x3/s1 convs, 16 -> 16 (identity shortcut)
    w = conv_w(ks[2], 3, 3, 16, 16); s, b = bn_fold(ks[3], 16)
    p['w_b1c1'] = banded_s1(w * s, 8, 16, 16).astype(jnp.bfloat16)
    p['b_b1c1'] = jnp.tile(b, 8).reshape(1, 128)
    w = conv_w(ks[4], 3, 3, 16, 16); s, b = bn_fold(ks[5], 16)
    p['w_b1c2'] = banded_s1(w * s, 8, 16, 16).astype(jnp.bfloat16)
    p['b_b1c2'] = jnp.tile(b, 8).reshape(1, 128)

    # basic block 2: 3x3/s2 (16->32) merged with 1x1/s2 projection; 3x3/s1 32->32
    w1 = conv_w(ks[6], 3, 3, 16, 32); s1, b1 = bn_fold(ks[7], 32)
    wp = conv_w(ks[8], 1, 1, 16, 32); sp, bp = bn_fold(ks[9], 32)
    p['w_b2m'] = banded_s2_merged(w1 * s1, (wp * sp)[0, 0],
                                  8, 4, 16, 32).astype(jnp.bfloat16)
    p['b_b2m'] = jnp.concatenate([jnp.tile(b1, 4), jnp.tile(bp, 4)]).reshape(1, 256)
    w = conv_w(ks[10], 3, 3, 32, 32); s, b = bn_fold(ks[11], 32)
    p['w_b2c2'] = banded_s1(w * s, 4, 32, 32).astype(jnp.bfloat16)
    p['b_b2c2'] = jnp.tile(b, 4).reshape(1, 128)

    # classifier 32 -> num_classes; GAP column-group sum and 1/16 folded in
    wfc = jax.random.normal(ks[12], (32, num_classes), jnp.float32) * (1.0 / 32.0) ** 0.5
    bfc = 0.01 * jax.random.normal(ks[13], (num_classes,), jnp.float32)
    wfc_p = jnp.zeros((128, 128), jnp.float32)
    for j in range(4):
        wfc_p = wfc_p.at[j * 32:(j + 1) * 32, :num_classes].set(wfc / 16.0)
    p['w_fc'] = wfc_p.astype(jnp.bfloat16)
    p['b_fc'] = jnp.zeros((1, 128), jnp.float32).at[0, :num_classes].set(bfc)
    return p


# ----------------------------------------------------------------------------
# Forward pass (== ResNet.forward(images) -> logits)
# ----------------------------------------------------------------------------

def _pick_block_batch(n, max_b=MAX_BLOCK_BATCH):
    # largest divisor of n that is <= max_b and keeps >= 2 grid steps (v7x)
    target = min(max_b, n if n < 2 else max(1, n // 2))
    for b in range(target, 0, -1):
        if n % b == 0:
            return b
    return 1


@functools.partial(jax.jit, static_argnames=("num_classes",))
def resnet_forward(params, images_nchw, num_classes=NUM_CLASSES):
    # NCHW (PyTorch) -> NHWC
    x = jnp.transpose(images_nchw, (0, 2, 3, 1)).astype(jnp.float32)
    n, h, w, c = x.shape
    assert (h, w, c) == (32, 32, IN_CH), "fused kernel is specialized to 3x32x32"
    bsz = _pick_block_batch(n)

    # Wrapper-side stem packing: per (sample, h-phase, w-phase, h2) emit the
    # 7x35x3 padded-input slab (735 bf16 features).  The banded stem weight
    # turns this into one lane-dense K=735, N=128 GEMM in the kernel.
    xpad = jnp.pad(x, ((0, 0), (3, 3), (3, 3), (0, 0)))          # (n,38,38,3)
    slabs = []
    for hp in range(2):
        for wp in range(2):
            sub = xpad[:, 2 * hp:2 * hp + 35, 2 * wp:2 * wp + 35, :]
            rows = jnp.stack([sub[:, 4 * h2:4 * h2 + 7] for h2 in range(8)],
                             axis=1)                             # (n,8,7,35,3)
            slabs.append(rows.reshape(n, 8, 735))
    xs = jnp.stack(slabs, axis=1).reshape(n, 32, 735).astype(jnp.bfloat16)

    out = pl.pallas_call(
        _resnet_kernel,
        out_shape=jax.ShapeDtypeStruct((n, 1, 128), jnp.float32),
        grid=(n // bsz,),
        in_specs=[
            pl.BlockSpec((bsz, 32, 735), lambda i: (i, 0, 0)),   # stem slabs
            pl.BlockSpec((735, 128), lambda i: (0, 0)),          # stem w
            pl.BlockSpec((1, 128), lambda i: (0, 0)),            # stem b
            pl.BlockSpec((384, 128), lambda i: (0, 0)),          # b1 conv1 w
            pl.BlockSpec((1, 128), lambda i: (0, 0)),
            pl.BlockSpec((384, 128), lambda i: (0, 0)),          # b1 conv2 w
            pl.BlockSpec((1, 128), lambda i: (0, 0)),
            pl.BlockSpec((384, 256), lambda i: (0, 0)),          # b2 merged w
            pl.BlockSpec((1, 256), lambda i: (0, 0)),
            pl.BlockSpec((384, 128), lambda i: (0, 0)),          # b2 conv2 w
            pl.BlockSpec((1, 128), lambda i: (0, 0)),
            pl.BlockSpec((128, 128), lambda i: (0, 0)),          # fc w
            pl.BlockSpec((1, 128), lambda i: (0, 0)),            # fc b
        ],
        out_specs=pl.BlockSpec((bsz, 1, 128), lambda i: (i, 0, 0)),
        scratch_shapes=[
            pltpu.VMEM((bsz, 10, 128), jnp.float32),   # block1 in / block1 out
            pltpu.VMEM((bsz, 10, 128), jnp.float32),   # block1 conv1 out
            pltpu.VMEM((bsz, 6, 128), jnp.float32),    # block2 conv1 out
        ],
        compiler_params=pltpu.CompilerParams(
            dimension_semantics=("parallel",)),
    )(xs, params['w_stem'], params['b_stem'],
      params['w_b1c1'], params['b_b1c1'], params['w_b1c2'], params['b_b1c2'],
      params['w_b2m'], params['b_b2m'], params['w_b2c2'], params['b_b2c2'],
      params['w_fc'], params['b_fc'])

    return out[:, 0, :num_classes]


if __name__ == "__main__":
    key = jax.random.PRNGKey(0)
    k_img, k_par = jax.random.split(key)

    images = jax.random.normal(k_img, (4, IN_CH, 32, 32), jnp.float32)  # NCHW
    params = init_resnet_params(k_par, num_classes=NUM_CLASSES)

    logits = resnet_forward(params, images)
    logits = jax.block_until_ready(logits)

    assert logits.shape == (4, NUM_CLASSES), logits.shape
    assert bool(jnp.all(jnp.isfinite(logits)))
    print("KERNEL_OK")
</pallas_src>

<mosaic_0001>
module attributes {stable_mosaic.version = 11 : i64} {
  func.func @_resnet_kernel(%arg0: i32, %arg1: memref<2x32x735xbf16, #tpu.memory_space<vmem>>, %arg2: memref<735x128xbf16, #tpu.memory_space<vmem>>, %arg3: memref<1x128xf32, #tpu.memory_space<vmem>>, %arg4: memref<384x128xbf16, #tpu.memory_space<vmem>>, %arg5: memref<1x128xf32, #tpu.memory_space<vmem>>, %arg6: memref<384x128xbf16, #tpu.memory_space<vmem>>, %arg7: memref<1x128xf32, #tpu.memory_space<vmem>>, %arg8: memref<384x256xbf16, #tpu.memory_space<vmem>>, %arg9: memref<1x256xf32, #tpu.memory_space<vmem>>, %arg10: memref<384x128xbf16, #tpu.memory_space<vmem>>, %arg11: memref<1x128xf32, #tpu.memory_space<vmem>>, %arg12: memref<128x128xbf16, #tpu.memory_space<vmem>>, %arg13: memref<1x128xf32, #tpu.memory_space<vmem>>, %arg14: memref<2x1x128xf32, #tpu.memory_space<vmem>>, %arg15: memref<2x10x128xf32, #tpu.memory_space<vmem>>, %arg16: memref<2x10x128xf32, #tpu.memory_space<vmem>>, %arg17: memref<2x6x128xf32, #tpu.memory_space<vmem>>) attributes {dimension_semantics = [#tpu.dimension_semantics<parallel>], iteration_bounds = array<i64: 2>, scalar_prefetch = 0 : i64, scratch_operands = 3 : i64, tpu.core_type = #tpu.core_type<tc>, window_params = [{transform_indices = @transform_0, window_bounds = array<i64: 2, 32, 735>}, {pipeline_mode = #tpu.pipeline_mode<synchronous>, transform_indices = @transform_1, window_bounds = array<i64: 735, 128>}, {pipeline_mode = #tpu.pipeline_mode<synchronous>, transform_indices = @transform_2, window_bounds = array<i64: 1, 128>}, {pipeline_mode = #tpu.pipeline_mode<synchronous>, transform_indices = @transform_3, window_bounds = array<i64: 384, 128>}, {pipeline_mode = #tpu.pipeline_mode<synchronous>, transform_indices = @transform_4, window_bounds = array<i64: 1, 128>}, {pipeline_mode = #tpu.pipeline_mode<synchronous>, transform_indices = @transform_5, window_bounds = array<i64: 384, 128>}, {pipeline_mode = #tpu.pipeline_mode<synchronous>, transform_indices = @transform_6, window_bounds = array<i64: 1, 128>}, {pipeline_mode = #tpu.pipeline_mode<synchronous>, transform_indices = @transform_7, window_bounds = array<i64: 384, 256>}, {pipeline_mode = #tpu.pipeline_mode<synchronous>, transform_indices = @transform_8, window_bounds = array<i64: 1, 256>}, {pipeline_mode = #tpu.pipeline_mode<synchronous>, transform_indices = @transform_9, window_bounds = array<i64: 384, 128>}, {pipeline_mode = #tpu.pipeline_mode<synchronous>, transform_indices = @transform_10, window_bounds = array<i64: 1, 128>}, {pipeline_mode = #tpu.pipeline_mode<synchronous>, transform_indices = @transform_11, window_bounds = array<i64: 128, 128>}, {pipeline_mode = #tpu.pipeline_mode<synchronous>, transform_indices = @transform_12, window_bounds = array<i64: 1, 128>}, {transform_indices = @transform_13, window_bounds = array<i64: 2, 1, 128>}]} {
    %cst = arith.constant 0.000000e+00 : f32
    %0 = vector.broadcast %cst : f32 to vector<2x1x128xf32>
    %c0 = arith.constant 0 : index
    %c0_0 = arith.constant 0 : index
    %c0_1 = arith.constant 0 : index
    %1 = vector.load %arg15[%c0, %c0_0, %c0_1] : memref<2x10x128xf32, #tpu.memory_space<vmem>>, vector<2x1x128xf32>
    tpu.vector_store %arg15[%c0, %c0_0, %c0_1], %0 {strides = array<i32>} : memref<2x10x128xf32, #tpu.memory_space<vmem>>, vector<2x1x128xf32>,
    %c0_2 = arith.constant 0 : index
    %c9 = arith.constant 9 : index
    %c0_3 = arith.constant 0 : index
    %2 = vector.load %arg15[%c0_2, %c9, %c0_3] : memref<2x10x128xf32, #tpu.memory_space<vmem>>, vector<2x1x128xf32>
    tpu.vector_store %arg15[%c0_2, %c9, %c0_3], %0 {strides = array<i32>} : memref<2x10x128xf32, #tpu.memory_space<vmem>>, vector<2x1x128xf32>,
    %c0_4 = arith.constant 0 : index
    %c0_5 = arith.constant 0 : index
    %c0_6 = arith.constant 0 : index
    %3 = vector.load %arg16[%c0_4, %c0_5, %c0_6] : memref<2x10x128xf32, #tpu.memory_space<vmem>>, vector<2x1x128xf32>
    tpu.vector_store %arg16[%c0_4, %c0_5, %c0_6], %0 {strides = array<i32>} : memref<2x10x128xf32, #tpu.memory_space<vmem>>, vector<2x1x128xf32>,
    %c0_7 = arith.constant 0 : index
    %c9_8 = arith.constant 9 : index
    %c0_9 = arith.constant 0 : index
    %4 = vector.load %arg16[%c0_7, %c9_8, %c0_9] : memref<2x10x128xf32, #tpu.memory_space<vmem>>, vector<2x1x128xf32>
    tpu.vector_store %arg16[%c0_7, %c9_8, %c0_9], %0 {strides = array<i32>} : memref<2x10x128xf32, #tpu.memory_space<vmem>>, vector<2x1x128xf32>,
    %c0_10 = arith.constant 0 : index
    %c0_11 = arith.constant 0 : index
    %c0_12 = arith.constant 0 : index
    %5 = vector.load %arg17[%c0_10, %c0_11, %c0_12] : memref<2x6x128xf32, #tpu.memory_space<vmem>>, vector<2x1x128xf32>
    tpu.vector_store %arg17[%c0_10, %c0_11, %c0_12], %0 {strides = array<i32>} : memref<2x6x128xf32, #tpu.memory_space<vmem>>, vector<2x1x128xf32>,
    %c0_13 = arith.constant 0 : index
    %c5 = arith.constant 5 : index
    %c0_14 = arith.constant 0 : index
    %6 = vector.load %arg17[%c0_13, %c5, %c0_14] : memref<2x6x128xf32, #tpu.memory_space<vmem>>, vector<2x1x128xf32>
    tpu.vector_store %arg17[%c0_13, %c5, %c0_14], %0 {strides = array<i32>} : memref<2x6x128xf32, #tpu.memory_space<vmem>>, vector<2x1x128xf32>,
    %c0_15 = arith.constant 0 : index
    %c0_16 = arith.constant 0 : index
    %c0_17 = arith.constant 0 : index
    %7 = vector.load %arg1[%c0_15, %c0_16, %c0_17] : memref<2x32x735xbf16, #tpu.memory_space<vmem>>, vector<2x32x735xbf16>
    %8 = vector.shape_cast %7 : vector<2x32x735xbf16> to vector<64x735xbf16>
    %c0_18 = arith.constant 0 : index
    %c0_19 = arith.constant 0 : index
    %9 = vector.load %arg2[%c0_18, %c0_19] : memref<735x128xbf16, #tpu.memory_space<vmem>>, vector<735x128xbf16>
    %cst_20 = arith.constant dense<0.000000e+00> : vector<64x128xf32>
    %10 = tpu.matmul %8, %9, %cst_20 {dimension_numbers = #tpu.dot_dimension_numbers<[1], [0], [0], [1], [0, 0, 1, 1], [], []>} : vector<64x735xbf16>, vector<735x128xbf16>, vector<64x128xf32> -> vector<64x128xf32>
    %c0_21 = arith.constant 0 : index
    %c0_22 = arith.constant 0 : index
    %11 = vector.load %arg3[%c0_21, %c0_22] : memref<1x128xf32, #tpu.memory_space<vmem>>, vector<1x128xf32>
    %12 = vector.broadcast %11 : vector<1x128xf32> to vector<64x128xf32>
    %13 = arith.addf %10, %12 : vector<64x128xf32>
    %cst_23 = arith.constant 0.000000e+00 : f32
    %14 = vector.broadcast %cst_23 : f32 to vector<64x128xf32>
    %15 = arith.maximumf %13, %14 : vector<64x128xf32>
    %16 = vector.shape_cast %15 : vector<64x128xf32> to vector<2x2x2x8x128xf32>
    %17 = vector.extract_strided_slice %16 {offsets = [0, 0, 0, 0, 0], sizes = [2, 1, 1, 8, 128], strides = [1, 1, 1, 1, 1]} : vector<2x2x2x8x128xf32> to vector<2x1x1x8x128xf32>
    %18 = vector.shape_cast %17 : vector<2x1x1x8x128xf32> to vector<2x8x128xf32>
    %19 = vector.extract_strided_slice %16 {offsets = [0, 0, 1, 0, 0], sizes = [2, 1, 1, 8, 128], strides = [1, 1, 1, 1, 1]} : vector<2x2x2x8x128xf32> to vector<2x1x1x8x128xf32>
    %20 = vector.shape_cast %19 : vector<2x1x1x8x128xf32> to vector<2x8x128xf32>
    %21 = vector.extract_strided_slice %16 {offsets = [0, 1, 0, 0, 0], sizes = [2, 1, 1, 8, 128], strides = [1, 1, 1, 1, 1]} : vector<2x2x2x8x128xf32> to vector<2x1x1x8x128xf32>
    %22 = vector.shape_cast %21 : vector<2x1x1x8x128xf32> to vector<2x8x128xf32>
    %23 = vector.extract_strided_slice %16 {offsets = [0, 1, 1, 0, 0], sizes = [2, 1, 1, 8, 128], strides = [1, 1, 1, 1, 1]} : vector<2x2x2x8x128xf32> to vector<2x1x1x8x128xf32>
    %24 = vector.shape_cast %23 : vector<2x1x1x8x128xf32> to vector<2x8x128xf32>
    %25 = tpu.iota {dimensions = array<i32: 2>} : vector<2x8x128xi32>
    %26 = arith.maximumf %18, %20 : vector<2x8x128xf32>
    %c16_i32 = arith.constant 16 : i32
    %27 = tpu.dynamic_rotate %20 by %c16_i32 dim 2 : vector<2x8x128xf32>, i32 -> vector<2x8x128xf32>
    %c16_i32_24 = arith.constant 16 : i32
    %28 = vector.broadcast %c16_i32_24 : i32 to vector<2x8x128xi32>
    %29 = arith.cmpi sge, %25, %28 : vector<2x8x128xi32>
    %cst_25 = arith.constant 0.000000e+00 : f32
    %30 = vector.broadcast %cst_25 : f32 to vector<2x8x128xf32>
    %31 = arith.select %29, %27, %30 : vector<2x8x128xi1>, vector<2x8x128xf32>
    %32 = arith.maximumf %26, %31 : vector<2x8x128xf32>
    %33 = arith.maximumf %22, %24 : vector<2x8x128xf32>
    %c16_i32_26 = arith.constant 16 : i32
    %34 = tpu.dynamic_rotate %24 by %c16_i32_26 dim 2 : vector<2x8x128xf32>, i32 -> vector<2x8x128xf32>
    %c16_i32_27 = arith.constant 16 : i32
    %35 = vector.broadcast %c16_i32_27 : i32 to vector<2x8x128xi32>
    %36 = arith.cmpi sge, %25, %35 : vector<2x8x128xi32>
    %cst_28 = arith.constant 0.000000e+00 : f32
    %37 = vector.broadcast %cst_28 : f32 to vector<2x8x128xf32>
    %38 = arith.select %36, %34, %37 : vector<2x8x128xi1>, vector<2x8x128xf32>
    %39 = arith.maximumf %33, %38 : vector<2x8x128xf32>
    %40 = arith.maximumf %32, %39 : vector<2x8x128xf32>
    %cst_29 = arith.constant 0.000000e+00 : f32
    %41 = vector.broadcast %cst_29 : f32 to vector<2x1x128xf32>
    %42 = vector.extract_strided_slice %39 {offsets = [0, 0, 0], sizes = [2, 7, 128], strides = [1, 1, 1]} : vector<2x8x128xf32> to vector<2x7x128xf32>
    %43 = tpu.concatenate %41, %42 in 1 : vector<2x1x128xf32>, vector<2x7x128xf32> -> vector<2x8x128xf32>
    %44 = arith.maximumf %40, %43 : vector<2x8x128xf32>
    %c0_30 = arith.constant 0 : index
    %c1 = arith.constant 1 : index
    %c0_31 = arith.constant 0 : index
    %45 = vector.load %arg15[%c0_30, %c1, %c0_31] : memref<2x10x128xf32, #tpu.memory_space<vmem>>, vector<2x8x128xf32>
    tpu.vector_store %arg15[%c0_30, %c1, %c0_31], %44 {strides = array<i32>} : memref<2x10x128xf32, #tpu.memory_space<vmem>>, vector<2x8x128xf32>,
    %c0_32 = arith.constant 0 : index
    %c0_33 = arith.constant 0 : index
    %c0_34 = arith.constant 0 : index
    %46 = vector.load %arg15[%c0_32, %c0_33, %c0_34] : memref<2x10x128xf32, #tpu.memory_space<vmem>>, vector<2x8x128xf32>
    %c0_35 = arith.constant 0 : index
    %c1_36 = arith.constant 1 : index
    %c0_37 = arith.constant 0 : index
    %47 = vector.load %arg15[%c0_35, %c1_36, %c0_37] : memref<2x10x128xf32, #tpu.memory_space<vmem>>, vector<2x8x128xf32>
    %c0_38 = arith.constant 0 : index
    %c2 = arith.constant 2 : index
    %c0_39 = arith.constant 0 : index
    %48 = vector.load %arg15[%c0_38, %c2, %c0_39] : memref<2x10x128xf32, #tpu.memory_space<vmem>>, vector<2x8x128xf32>
    %49 = tpu.concatenate %46, %47, %48 in 2 : vector<2x8x128xf32>, vector<2x8x128xf32>, vector<2x8x128xf32> -> vector<2x8x384xf32>
    %50 = vector.shape_cast %49 : vector<2x8x384xf32> to vector<16x384xf32>
    %51 = arith.truncf %50 : vector<16x384xf32> to vector<16x384xbf16>
    %c0_40 = arith.constant 0 : index
    %c0_41 = arith.constant 0 : index
    %52 = vector.load %arg4[%c0_40, %c0_41] : memref<384x128xbf16, #tpu.memory_space<vmem>>, vector<384x128xbf16>
    %cst_42 = arith.constant dense<0.000000e+00> : vector<16x128xf32>
    %53 = tpu.matmul %51, %52, %cst_42 {dimension_numbers = #tpu.dot_dimension_numbers<[1], [0], [0], [1], [0, 0, 1, 1], [], []>} : vector<16x384xbf16>, vector<384x128xbf16>, vector<16x128xf32> -> vector<16x128xf32>
    %c0_43 = arith.constant 0 : index
    %c0_44 = arith.constant 0 : index
    %54 = vector.load %arg5[%c0_43, %c0_44] : memref<1x128xf32, #tpu.memory_space<vmem>>, vector<1x128xf32>
    %55 = vector.broadcast %54 : vector<1x128xf32> to vector<16x128xf32>
    %56 = arith.addf %53, %55 : vector<16x128xf32>
    %cst_45 = arith.constant 0.000000e+00 : f32
    %57 = vector.broadcast %cst_45 : f32 to vector<16x128xf32>
    %58 = arith.maximumf %56, %57 : vector<16x128xf32>
    %59 = vector.shape_cast %58 : vector<16x128xf32> to vector<2x8x128xf32>
    %c0_46 = arith.constant 0 : index
    %c1_47 = arith.constant 1 : index
    %c0_48 = arith.constant 0 : index
    %60 = vector.load %arg16[%c0_46, %c1_47, %c0_48] : memref<2x10x128xf32, #tpu.memory_space<vmem>>, vector<2x8x128xf32>
    tpu.vector_store %arg16[%c0_46, %c1_47, %c0_48], %59 {strides = array<i32>} : memref<2x10x128xf32, #tpu.memory_space<vmem>>, vector<2x8x128xf32>,
    %c0_49 = arith.constant 0 : index
    %c0_50 = arith.constant 0 : index
    %c0_51 = arith.constant 0 : index
    %61 = vector.load %arg16[%c0_49, %c0_50, %c0_51] : memref<2x10x128xf32, #tpu.memory_space<vmem>>, vector<2x8x128xf32>
    %c0_52 = arith.constant 0 : index
    %c1_53 = arith.constant 1 : index
    %c0_54 = arith.constant 0 : index
    %62 = vector.load %arg16[%c0_52, %c1_53, %c0_54] : memref<2x10x128xf32, #tpu.memory_space<vmem>>, vector<2x8x128xf32>
    %c0_55 = arith.constant 0 : index
    %c2_56 = arith.constant 2 : index
    %c0_57 = arith.constant 0 : index
    %63 = vector.load %arg16[%c0_55, %c2_56, %c0_57] : memref<2x10x128xf32, #tpu.memory_space<vmem>>, vector<2x8x128xf32>
    %64 = tpu.concatenate %61, %62, %63 in 2 : vector<2x8x128xf32>, vector<2x8x128xf32>, vector<2x8x128xf32> -> vector<2x8x384xf32>
    %65 = vector.shape_cast %64 : vector<2x8x384xf32> to vector<16x384xf32>
    %66 = arith.truncf %65 : vector<16x384xf32> to vector<16x384xbf16>
    %c0_58 = arith.constant 0 : index
    %c0_59 = arith.constant 0 : index
    %67 = vector.load %arg6[%c0_58, %c0_59] : memref<384x128xbf16, #tpu.memory_space<vmem>>, vector<384x128xbf16>
    %cst_60 = arith.constant dense<0.000000e+00> : vector<16x128xf32>
    %68 = tpu.matmul %66, %67, %cst_60 {dimension_numbers = #tpu.dot_dimension_numbers<[1], [0], [0], [1], [0, 0, 1, 1], [], []>} : vector<16x384xbf16>, vector<384x128xbf16>, vector<16x128xf32> -> vector<16x128xf32>
    %c0_61 = arith.constant 0 : index
    %c0_62 = arith.constant 0 : index
    %69 = vector.load %arg7[%c0_61, %c0_62] : memref<1x128xf32, #tpu.memory_space<vmem>>, vector<1x128xf32>
    %70 = vector.broadcast %69 : vector<1x128xf32> to vector<16x128xf32>
    %71 = arith.addf %68, %70 : vector<16x128xf32>
    %72 = vector.shape_cast %71 : vector<16x128xf32> to vector<2x8x128xf32>
    %73 = arith.addf %72, %44 : vector<2x8x128xf32>
    %cst_63 = arith.constant 0.000000e+00 : f32
    %74 = vector.broadcast %cst_63 : f32 to vector<2x8x128xf32>
    %75 = arith.maximumf %73, %74 : vector<2x8x128xf32>
    %c0_64 = arith.constant 0 : index
    %c1_65 = arith.constant 1 : index
    %c0_66 = arith.constant 0 : index
    %76 = vector.load %arg15[%c0_64, %c1_65, %c0_66] : memref<2x10x128xf32, #tpu.memory_space<vmem>>, vector<2x8x128xf32>
    tpu.vector_store %arg15[%c0_64, %c1_65, %c0_66], %75 {strides = array<i32>} : memref<2x10x128xf32, #tpu.memory_space<vmem>>, vector<2x8x128xf32>,
    %c0_67 = arith.constant 0 : index
    %c0_68 = arith.constant 0 : index
    %c0_69 = arith.constant 0 : index
    %77 = tpu.strided_load %arg15[%c0_67, %c0_68, %c0_69] {strides = array<i32: 1, 2, 1>} : memref<2x10x128xf32, #tpu.memory_space<vmem>>, vector<2x4x128xf32>
    %c0_70 = arith.constant 0 : index
    %c1_71 = arith.constant 1 : index
    %c0_72 = arith.constant 0 : index
    %78 = tpu.strided_load %arg15[%c0_70, %c1_71, %c0_72] {strides = array<i32: 1, 2, 1>} : memref<2x10x128xf32, #tpu.memory_space<vmem>>, vector<2x4x128xf32>
    %c0_73 = arith.constant 0 : index
    %c2_74 = arith.constant 2 : index
    %c0_75 = arith.constant 0 : index
    %79 = tpu.strided_load %arg15[%c0_73, %c2_74, %c0_75] {strides = array<i32: 1, 2, 1>} : memref<2x10x128xf32, #tpu.memory_space<vmem>>, vector<2x4x128xf32>
    %80 = tpu.concatenate %77, %78, %79 in 2 : vector<2x4x128xf32>, vector<2x4x128xf32>, vector<2x4x128xf32> -> vector<2x4x384xf32>
    %81 = vector.shape_cast %80 : vector<2x4x384xf32> to vector<8x384xf32>
    %82 = arith.truncf %81 : vector<8x384xf32> to vector<8x384xbf16>
    %c0_76 = arith.constant 0 : index
    %c0_77 = arith.constant 0 : index
    %83 = vector.load %arg8[%c0_76, %c0_77] : memref<384x256xbf16, #tpu.memory_space<vmem>>, vector<384x256xbf16>
    %cst_78 = arith.constant dense<0.000000e+00> : vector<8x256xf32>
    %84 = tpu.matmul %82, %83, %cst_78 {dimension_numbers = #tpu.dot_dimension_numbers<[1], [0], [0], [1], [0, 0, 1, 1], [], []>} : vector<8x384xbf16>, vector<384x256xbf16>, vector<8x256xf32> -> vector<8x256xf32>
    %c0_79 = arith.constant 0 : index
    %c0_80 = arith.constant 0 : index
    %85 = vector.load %arg9[%c0_79, %c0_80] : memref<1x256xf32, #tpu.memory_space<vmem>>, vector<1x256xf32>
    %86 = vector.broadcast %85 : vector<1x256xf32> to vector<8x256xf32>
    %87 = arith.addf %84, %86 : vector<8x256xf32>
    %88 = vector.extract_strided_slice %87 {offsets = [0, 0], sizes = [8, 128], strides = [1, 1]} : vector<8x256xf32> to vector<8x128xf32>
    %cst_81 = arith.constant 0.000000e+00 : f32
    %89 = vector.broadcast %cst_81 : f32 to vector<8x128xf32>
    %90 = arith.maximumf %88, %89 : vector<8x128xf32>
    %91 = vector.extract_strided_slice %87 {offsets = [0, 128], sizes = [8, 128], strides = [1, 1]} : vector<8x256xf32> to vector<8x128xf32>
    %92 = vector.shape_cast %90 : vector<8x128xf32> to vector<2x4x128xf32>
    %c0_82 = arith.constant 0 : index
    %c1_83 = arith.constant 1 : index
    %c0_84 = arith.constant 0 : index
    %93 = vector.load %arg17[%c0_82, %c1_83, %c0_84] : memref<2x6x128xf32, #tpu.memory_space<vmem>>, vector<2x4x128xf32>
    tpu.vector_store %arg17[%c0_82, %c1_83, %c0_84], %92 {strides = array<i32>} : memref<2x6x128xf32, #tpu.memory_space<vmem>>, vector<2x4x128xf32>,
    %c0_85 = arith.constant 0 : index
    %c0_86 = arith.constant 0 : index
    %c0_87 = arith.constant 0 : index
    %94 = vector.load %arg17[%c0_85, %c0_86, %c0_87] : memref<2x6x128xf32, #tpu.memory_space<vmem>>, vector<2x4x128xf32>
    %c0_88 = arith.constant 0 : index
    %c1_89 = arith.constant 1 : index
    %c0_90 = arith.constant 0 : index
    %95 = vector.load %arg17[%c0_88, %c1_89, %c0_90] : memref<2x6x128xf32, #tpu.memory_space<vmem>>, vector<2x4x128xf32>
    %c0_91 = arith.constant 0 : index
    %c2_92 = arith.constant 2 : index
    %c0_93 = arith.constant 0 : index
    %96 = vector.load %arg17[%c0_91, %c2_92, %c0_93] : memref<2x6x128xf32, #tpu.memory_space<vmem>>, vector<2x4x128xf32>
    %97 = tpu.concatenate %94, %95, %96 in 2 : vector<2x4x128xf32>, vector<2x4x128xf32>, vector<2x4x128xf32> -> vector<2x4x384xf32>
    %98 = vector.shape_cast %97 : vector<2x4x384xf32> to vector<8x384xf32>
    %99 = arith.truncf %98 : vector<8x384xf32> to vector<8x384xbf16>
    %c0_94 = arith.constant 0 : index
    %c0_95 = arith.constant 0 : index
    %100 = vector.load %arg10[%c0_94, %c0_95] : memref<384x128xbf16, #tpu.memory_space<vmem>>, vector<384x128xbf16>
    %cst_96 = arith.constant dense<0.000000e+00> : vector<8x128xf32>
    %101 = tpu.matmul %99, %100, %cst_96 {dimension_numbers = #tpu.dot_dimension_numbers<[1], [0], [0], [1], [0, 0, 1, 1], [], []>} : vector<8x384xbf16>, vector<384x128xbf16>, vector<8x128xf32> -> vector<8x128xf32>
    %c0_97 = arith.constant 0 : index
    %c0_98 = arith.constant 0 : index
    %102 = vector.load %arg11[%c0_97, %c0_98] : memref<1x128xf32, #tpu.memory_space<vmem>>, vector<1x128xf32>
    %103 = vector.broadcast %102 : vector<1x128xf32> to vector<8x128xf32>
    %104 = arith.addf %101, %103 : vector<8x128xf32>
    %105 = arith.addf %104, %91 : vector<8x128xf32>
    %cst_99 = arith.constant 0.000000e+00 : f32
    %106 = vector.broadcast %cst_99 : f32 to vector<8x128xf32>
    %107 = arith.maximumf %105, %106 : vector<8x128xf32>
    %108 = vector.shape_cast %107 : vector<8x128xf32> to vector<2x4x128xf32>
    %cst_100 = arith.constant dense<0.000000e+00> : vector<2x128xf32>
    %109 = vector.multi_reduction <add>, %108, %cst_100 [1] : vector<2x4x128xf32> to vector<2x128xf32>
    %110 = arith.truncf %109 : vector<2x128xf32> to vector<2x128xbf16>
    %c0_101 = arith.constant 0 : index
    %c0_102 = arith.constant 0 : index
    %111 = vector.load %arg12[%c0_101, %c0_102] : memref<128x128xbf16, #tpu.memory_space<vmem>>, vector<128x128xbf16>
    %cst_103 = arith.constant dense<0.000000e+00> : vector<2x128xf32>
    %112 = tpu.matmul %110, %111, %cst_103 {dimension_numbers = #tpu.dot_dimension_numbers<[1], [0], [0], [1], [0, 0, 1, 1], [], []>} : vector<2x128xbf16>, vector<128x128xbf16>, vector<2x128xf32> -> vector<2x128xf32>
    %c0_104 = arith.constant 0 : index
    %c0_105 = arith.constant 0 : index
    %113 = vector.load %arg13[%c0_104, %c0_105] : memref<1x128xf32, #tpu.memory_space<vmem>>, vector<1x128xf32>
    %114 = vector.broadcast %113 : vector<1x128xf32> to vector<2x128xf32>
    %115 = arith.addf %112, %114 : vector<2x128xf32>
    %c0_106 = arith.constant 0 : index
    %c0_107 = arith.constant 0 : index
    %c0_108 = arith.constant 0 : index
    %116 = vector.load %arg14[%c0_106, %c0_107, %c0_108] : memref<2x1x128xf32, #tpu.memory_space<vmem>>, vector<2x1x128xf32>
    %117 = vector.shape_cast %116 : vector<2x1x128xf32> to vector<2x128xf32>
    %118 = vector.shape_cast %115 : vector<2x128xf32> to vector<2x1x128xf32>
    tpu.vector_store %arg14[%c0_106, %c0_107, %c0_108], %118 {strides = array<i32>} : memref<2x1x128xf32, #tpu.memory_space<vmem>>, vector<2x1x128xf32>,
    return
  }
  func.func @transform_0(%arg0: i32) -> (i32, i32, i32) {
    %c0_i32 = arith.constant 0 : i32
    %c0_i32_0 = arith.constant 0 : i32
    %c0_i32_1 = arith.constant 0 : i32
    return %arg0, %c0_i32, %c0_i32_0 : i32, i32, i32
  }
  func.func @transform_1(%arg0: i32) -> (i32, i32) {
    %c0_i32 = arith.constant 0 : i32
    %c0_i32_0 = arith.constant 0 : i32
    %c0_i32_1 = arith.constant 0 : i32
    return %c0_i32, %c0_i32_0 : i32, i32
  }
  func.func @transform_2(%arg0: i32) -> (i32, i32) {
    %c0_i32 = arith.constant 0 : i32
    %c0_i32_0 = arith.constant 0 : i32
    %c0_i32_1 = arith.constant 0 : i32
    return %c0_i32, %c0_i32_0 : i32, i32
  }
  func.func @transform_3(%arg0: i32) -> (i32, i32) {
    %c0_i32 = arith.constant 0 : i32
    %c0_i32_0 = arith.constant 0 : i32
    %c0_i32_1 = arith.constant 0 : i32
    return %c0_i32, %c0_i32_0 : i32, i32
  }
  func.func @transform_4(%arg0: i32) -> (i32, i32) {
    %c0_i32 = arith.constant 0 : i32
    %c0_i32_0 = arith.constant 0 : i32
    %c0_i32_1 = arith.constant 0 : i32
    return %c0_i32, %c0_i32_0 : i32, i32
  }
  func.func @transform_5(%arg0: i32) -> (i32, i32) {
    %c0_i32 = arith.constant 0 : i32
    %c0_i32_0 = arith.constant 0 : i32
    %c0_i32_1 = arith.constant 0 : i32
    return %c0_i32, %c0_i32_0 : i32, i32
  }
  func.func @transform_6(%arg0: i32) -> (i32, i32) {
    %c0_i32 = arith.constant 0 : i32
    %c0_i32_0 = arith.constant 0 : i32
    %c0_i32_1 = arith.constant 0 : i32
    return %c0_i32, %c0_i32_0 : i32, i32
  }
  func.func @transform_7(%arg0: i32) -> (i32, i32) {
    %c0_i32 = arith.constant 0 : i32
    %c0_i32_0 = arith.constant 0 : i32
    %c0_i32_1 = arith.constant 0 : i32
    return %c0_i32, %c0_i32_0 : i32, i32
  }
  func.func @transform_8(%arg0: i32) -> (i32, i32) {
    %c0_i32 = arith.constant 0 : i32
    %c0_i32_0 = arith.constant 0 : i32
    %c0_i32_1 = arith.constant 0 : i32
    return %c0_i32, %c0_i32_0 : i32, i32
  }
  func.func @transform_9(%arg0: i32) -> (i32, i32) {
    %c0_i32 = arith.constant 0 : i32
    %c0_i32_0 = arith.constant 0 : i32
    %c0_i32_1 = arith.constant 0 : i32
    return %c0_i32, %c0_i32_0 : i32, i32
  }
  func.func @transform_10(%arg0: i32) -> (i32, i32) {
    %c0_i32 = arith.constant 0 : i32
    %c0_i32_0 = arith.constant 0 : i32
    %c0_i32_1 = arith.constant 0 : i32
    return %c0_i32, %c0_i32_0 : i32, i32
  }
  func.func @transform_11(%arg0: i32) -> (i32, i32) {
    %c0_i32 = arith.constant 0 : i32
    %c0_i32_0 = arith.constant 0 : i32
    %c0_i32_1 = arith.constant 0 : i32
    return %c0_i32, %c0_i32_0 : i32, i32
  }
  func.func @transform_12(%arg0: i32) -> (i32, i32) {
    %c0_i32 = arith.constant 0 : i32
    %c0_i32_0 = arith.constant 0 : i32
    %c0_i32_1 = arith.constant 0 : i32
    return %c0_i32, %c0_i32_0 : i32, i32
  }
  func.func @transform_13(%arg0: i32) -> (i32, i32, i32) {
    %c0_i32 = arith.constant 0 : i32
    %c0_i32_0 = arith.constant 0 : i32
    %c0_i32_1 = arith.constant 0 : i32
    return %arg0, %c0_i32, %c0_i32_0 : i32, i32, i32
  }
}

</mosaic_0001>

<bundles_post_ra>
// kernel: resnet_forward.1
= control target key start
LH: loop header
LB: loop body
LE: loop exit
PB: predicated region body
PF: predicated region fallthrough
CT: control target
= control target key end

     0   :  { %18 = vsyncpa [#allocation6], 0  ;;  %s4496_s0 = inlined_call_operand.vmem [shape: bf16[4,32,735], index: 0, kind: input, shape index: {}]   ;;  %s4497_s1 = inlined_call_operand.vmem [shape: bf16[735,128], index: 1, kind: input, shape index: {}]   ;;  %s4498_s2 = inlined_call_operand.vmem [shape: f32[1,128], index: 2, kind: input, shape index: {}]   ;;  %s4499_s3 = inlined_call_operand.vmem [shape: bf16[384,128], index: 3, kind: input, shape index: {}]   ;;  %s4500_s4 = inlined_call_operand.vmem [shape: f32[1,128], index: 4, kind: input, shape index: {}]   ;;  %s4501_s5 = inlined_call_operand.vmem [shape: bf16[384,128], index: 5, kind: input, shape index: {}]   ;;  %s4502_s6 = inlined_call_operand.vmem [shape: f32[1,128], index: 6, kind: input, shape index: {}]   ;;  %s4503_s7 = inlined_call_operand.vmem [shape: bf16[384,256], index: 7, kind: input, shape index: {}]   ;;  %s4504_s8 = inlined_call_operand.vmem [shape: f32[1,256], index: 8, kind: input, shape index: {}]   ;;  %s4505_s9 = inlined_call_operand.vmem [shape: bf16[384,128], index: 9, kind: input, shape index: {}]   ;;  %s4506_s10 = inlined_call_operand.vmem [shape: f32[1,128], index: 10, kind: input, shape index: {}]   ;;  %s4507_s11 = inlined_call_operand.vmem [shape: bf16[128,128], index: 11, kind: input, shape index: {}]   ;;  %s4508_s12 = inlined_call_operand.vmem [shape: f32[1,128], index: 12, kind: input, shape index: {}]   ;;  %s4509_s13 = inlined_call_operand.hbm [shape: f32[4,1,128], index: 13, kind: output, shape index: {}]  }
   0x1   :  { %20 = vsyncpa [#allocation6 + $0x1], 0  ;;  %s3705_s25 = smov 0   ;;  %s3707_s26 = smov 0  }
   0x2   :  { %s3709_s27 = smov 0   ;;  %s3711_s28 = smov 0  }
   0x3 LB: > { %4514 = sst [smem:[#allocation8_spill]] %s3621_s27  ;;  %s3726_s29 = sadd.s32 4294967295, %s3625_s28   ;;  %s3625_s28 = sphi %s3711_s28, %s4520_s28   ;;  %s3621_s27 = sphi %s3709_s27, %s4522_s27   ;;  %s3617_s26 = sphi %s3707_s26, %s4524_s26   ;;  %s3613_s25 = sphi %s3705_s25, %s4523_s25  }
   0x4   : > { %s2785_s30 = sadd.s32 4294967294, %s3625_s28   ;;  %s3730_s14 = sadd.s32 1, %s3625_s28  }
   0x5   : > { %4515 = sst [smem:[#allocation9_spill]] %s3730_s14  ;;  %s311_s15 = sadd.s32 1, %s3621_s27 }
   0x6   : > { %s308_s16 = ssub.s32 %s3625_s28, %s3730_s14  ;;  %p321_p0 = scmp.ne.s32.totalorder %s3621_s27, %s3617_s26 }
   0x7   : > { %p309_p1 = scmp.eq.s32.totalorder %s308_s16, 0  ;;  %p322_p2 = scmp.eq.s32.totalorder %s3726_s29, 1 }
   0x8   : > { %p327_p3 = scmp.ne.s32.totalorder %s3617_s26, %s3613_s25  ;;  %p328_p4 = scmp.eq.s32.totalorder %s2785_s30, 1 }
   0x9   : > { %s3741_s17 = scalar_select %p309_p1, %s3621_s27, %s311_s15  }
   0xa   : > { %p3743_p5 = por %p322_p2, %p321_p0  ;;  %p3747_p6 = por %p328_p4, %p327_p3 }
   0xb   : > { %4516 = sst [smem:[#allocation10_spill]] %s3741_s17  ;;  %p2788_p7 = scmp.ge.s32.totalorder %s3625_s28, 1 }
   0xc   : > { %p392_p8 = scmp.lt.s32.totalorder %s3625_s28, 3 }
   0xe   : > { %p393_p9 = pnand %p2788_p7, %p392_p8 }
   0xf   : > { %v3326_v0 = vld [vmem:[%s4497_s1 + $0x40] sm:$0xff] (!%p393_p9)   ;;  %v3330_v4 = vld [vmem:[%s4497_s1 + $0x48] sm:$0xff] (!%p393_p9)   ;;  %v3334_v8 = vld [vmem:[%s4497_s1 + $0x50] sm:$0xff] (!%p393_p9)   ;;  %s2790_s17 = sshll.u32 (!%p393_p9), %s3726_s29, 1  ;;  %v3627_v33 = vmov (!%p393_p9), 0   ;;  %vm985_vm0 = vcmask (!%p393_p9), 1046528  }
  0x10   : > { %396 = sbr.rel (%p393_p9) target bundleno = 1744 (0x6d0), region = 72  ;;  %v3327_v1 = vld [vmem:[%s4497_s1] sm:$0xff] (!%p393_p9)   ;;  %3011 = vmatprep.subr.bf16.mxu0 (!%p393_p9), %v3326_v0  ;;  %v3331_v5 = vld [vmem:[%s4497_s1 + $0x8] sm:$0xff] (!%p393_p9)   ;;  %v3335_v9 = vld [vmem:[%s4497_s1 + $0x10] sm:$0xff] (!%p393_p9)   ;;  %p438_p10 = scmp.lt.s32.totalorder (!%p393_p9), %s2790_s17, 3  ;;  %vm986_vm1 = vcmask (!%p393_p9), 1047552  }
  0x11   : > { %v3328_v2 = vld [vmem:[%s4497_s1 + $0xc0] sm:$0xff] (!%p393_p9)   ;;  %3012 = vmatpush3.bf16.msra.mxu0 (!%p393_p9), %v3327_v1  ;;  %v3332_v6 = vld [vmem:[%s4497_s1 + $0xc8] sm:$0xff] (!%p393_p9)   ;;  %v3336_v10 = vld [vmem:[%s4497_s1 + $0xd0] sm:$0xff] (!%p393_p9)   ;;  %v3628_v55 = vmov (!%p393_p9), 65535   ;;  %vm972_vm2 = vcmask (!%p393_p9), 777216   ;;  %s4513_s27 = smov (!%p393_p9), 16  }
  0x12   : > { %v3329_v3 = vld [vmem:[%s4497_s1 + $0x80] sm:$0xff] (!%p393_p9)   ;;  %3051 = vmatprep.subr.bf16.mxu1 (!%p393_p9), %v3328_v2  ;;  %3013 = vmatprep.subr.bf16.mxu0 (!%p393_p9), %v3330_v4  ;;  %v3333_v7 = vld [vmem:[%s4497_s1 + $0x88] sm:$0xff] (!%p393_p9)   ;;  %v3337_v11 = vld [vmem:[%s4497_s1 + $0x90] sm:$0xff] (!%p393_p9)   ;;  %v987_v56 = vsel (!%p393_p9), %vm985_vm0, 4294967295, %v3628_v55  ;;  %vm1226_vm4 = vcmask (!%p393_p9), 1040384   ;;  %vm3631_vm5 = vmmov (!%p393_p9), 0  }
  0x13   : > { %3052 = vmatpush3.bf16.msra.mxu1 (!%p393_p9), %v3329_v3  ;;  %v3338_v12 = vld [vmem:[%s4497_s1 + $0x58] sm:$0xff] (!%p393_p9)   ;;  %v3342_v16 = vld [vmem:[%s4497_s1 + $0x60] sm:$0xff] (!%p393_p9)   ;;  %v3346_v20 = vld [vmem:[%s4497_s1 + $0x68] sm:$0xff] (!%p393_p9)   ;;  %v988_v60 = vsel (!%p393_p9), %vm986_vm1, %v987_v56, 0  ;;  %vm2546_vm6 = vcmask (!%p393_p9), 1043456   ;;  %vm2590_vm7 = vcmask (!%p393_p9), 1041409  }
  0x14   : > { %3053 = vmatprep.subr.bf16.mxu1 (!%p393_p9), %v3332_v6  ;;  %v3339_v13 = vld [vmem:[%s4497_s1 + $0x18] sm:$0xff] (!%p393_p9)   ;;  %v3343_v17 = vld [vmem:[%s4497_s1 + $0x20] sm:$0xff] (!%p393_p9)   ;;  %v3347_v21 = vld [vmem:[%s4497_s1 + $0x28] sm:$0xff] (!%p393_p9)   ;;  %s434_s22 = sand.u32 (!%p393_p9), 1, %s3617_s26  }
  0x15   : > { %3014 = vmatpush3.bf16.msra.mxu0 (!%p393_p9), %v3331_v5  ;;  %v3340_v14 = vld [vmem:[%s4497_s1 + $0xd8] sm:$0xff] (!%p393_p9)   ;;  %v3344_v18 = vld [vmem:[%s4497_s1 + $0xe0] sm:$0xff] (!%p393_p9)   ;;  %v3348_v22 = vld [vmem:[%s4497_s1 + $0xe8] sm:$0xff] (!%p393_p9)   ;;  %s2789_s24 = sshll.u32 (!%p393_p9), %s434_s22, 1 }
  0x16   : > { %3015 = vmatprep.subr.bf16.mxu0 (!%p393_p9), %v3334_v8  ;;  %v3341_v15 = vld [vmem:[%s4497_s1 + $0x98] sm:$0xff] (!%p393_p9)   ;;  %v3345_v19 = vld [vmem:[%s4497_s1 + $0xa0] sm:$0xff] (!%p393_p9)   ;;  %v3349_v23 = vld [vmem:[%s4497_s1 + $0xa8] sm:$0xff] (!%p393_p9)  }
  0x17   : > { %3054 = vmatpush3.bf16.msra.mxu1 %v3333_v7  ;;  %s4526_s17 = smov (!%p438_p10, %s2790_s17), 3  ;;  %v3350_v24 = vld [vmem:[%s4497_s1 + $0x70] sm:$0xff]   ;;  %v3354_v28 = vld [vmem:[%s4497_s1 + $0x78] sm:$0xff]   ;;  %v3364_v37 = vld [vmem:[%s4497_s1 + $0x100] sm:$0xff]  }
  0x18   : > { %3055 = vmatprep.subr.bf16.mxu1 %v3336_v10  ;;  %s3279_s23 = smul.u32 96, %s4526_s17  ;;  %v3351_v25 = vld [vmem:[%s4497_s1 + $0x30] sm:$0xff]   ;;  %v3355_v29 = vld [vmem:[%s4497_s1 + $0x38] sm:$0xff]   ;;  %v3365_v38 = vld [vmem:[%s4497_s1 + $0x108] sm:$0xff]  }
  0x19   : > { %3016 = vmatpush3.bf16.msra.mxu0 %v3335_v9  ;;  %v3352_v26 = vld [vmem:[%s4497_s1 + $0xf0] sm:$0xff]   ;;  %v3356_v30 = vld [vmem:[%s4497_s1 + $0xf8] sm:$0xff]   ;;  %v3368_v46 = vld [vmem:[%s4497_s1 + $0x120] sm:$0xff]  }
  0x1a   : > { %3017 = vmatprep.subr.bf16.mxu0 %v3338_v12  ;;  %v3353_v27 = vld [vmem:[%s4497_s1 + $0xb0] sm:$0xff]   ;;  %s3844_s14 = scalar_lea.vmem %s4496_s0, %s3279_s23  ;;  %v3360_v34 = vld [vmem:[%s4497_s1 + $0xb8] sm:$0xff]   ;;  %v3369_v51 = vld [vmem:[%s4497_s1 + $0x128] sm:$0xff]   ;;  %s436_s23 = scalar_lea.vmem [#allocation5], %s2789_s24 }
  0x1b   : > { %3056 = vmatpush3.bf16.msra.mxu1 %v3337_v11  ;;  %v3357_v31 = vld [vmem:[%s3844_s14] ss:$24 sps:$4 sm:$0xff]   ;;  %v3359_v32 = vld [vmem:[%s3844_s14 + $0x4] ss:$24 sps:$4 sm:$0xff]   ;;  %v3366_v39 = vld [vmem:[%s4497_s1 + $0x110] sm:$0xff]   ;;  %s2723_s16 = sshll.u32 %s436_s23, 4  ;;  %s4446_s16 = int_to_ptr.vmem [resolvable:$true] %s2723_s16 }
  0x1c   : > { %3057 = vmatprep.subr.bf16.mxu1 %v3340_v14  ;;  %1024 = vmatprep.mubr.bf16.mxu0 %v3359_v32  ;;  %v3361_v35 = vld [vmem:[%s3844_s14 + $0x8] ss:$24 sps:$4 sm:$0xff]   ;;  %v3363_v36 = vld [vmem:[%s3844_s14 + $0xc] ss:$24 sps:$4 sm:$0xff]   ;;  %v3367_v42 = vld [vmem:[%s4497_s1 + $0x118] sm:$0xff]   ;;  %s4453_s24 = scalar_lea.sflag [#allocation6], %s434_s22 }
  0x1d   : > { %3018 = vmatpush3.bf16.msra.mxu0 %v3339_v13  ;;  %1089 = vmatprep.mubr.bf16.mxu1 %v3363_v36  ;;  %v3371_v40 = vld [vmem:[%s3844_s14 + $0x34] ss:$24 sps:$4 sm:$0xff]   ;;  %v3373_v41 = vld [vmem:[%s3844_s14 + $0x30] ss:$24 sps:$4 sm:$0xff]   ;;  %v3379_v45 = vld [vmem:[%s3844_s14 + $0x64] ss:$24 sps:$4 sm:$0xff]  }
  0x1e   : > { %3019 = vmatprep.subr.bf16.mxu0 %v3342_v16  ;;  %v3375_v43 = vld [vmem:[%s3844_s14 + $0x3c] ss:$24 sps:$4 sm:$0xff]   ;;  %v3377_v44 = vld [vmem:[%s3844_s14 + $0x38] ss:$24 sps:$4 sm:$0xff]   ;;  %v3383_v47 = vld [vmem:[%s3844_s14 + $0x6c] ss:$24 sps:$4 sm:$0xff]  }
  0x1f   : > { %3058 = vmatpush3.bf16.msra.mxu1 %v3341_v15  ;;  %v3381_v48 = vld [vmem:[%s3844_s14 + $0x60] ss:$24 sps:$4 sm:$0xff]   ;;  %v3387_v49 = vld [vmem:[%s3844_s14 + $0x94] ss:$24 sps:$4 sm:$0xff]   ;;  %v3389_v54 = vld [vmem:[%s3844_s14 + $0x90] ss:$24 sps:$4 sm:$0xff]  }
  0x20   : > { %3059 = vmatprep.subr.bf16.mxu1 %v3344_v18  ;;  %v3385_v50 = vld [vmem:[%s3844_s14 + $0x68] ss:$24 sps:$4 sm:$0xff]   ;;  %v3391_v52 = vld [vmem:[%s3844_s14 + $0x9c] ss:$24 sps:$4 sm:$0xff]   ;;  %v3393_v58 = vld [vmem:[%s3844_s14 + $0x98] ss:$24 sps:$4 sm:$0xff]  }
  0x21   : > { %3020 = vmatpush3.bf16.msra.mxu0 %v3343_v17  ;;  %v3370_v53 = vld [vmem:[%s4497_s1 + $0x130] sm:$0xff]   ;;  %v3374_v59 = vld [vmem:[%s4497_s1 + $0x138] sm:$0xff]   ;;  %v3378_v61 = vld [vmem:[%s4497_s1 + $0x140] sm:$0xff]   ;;  %s3563_s30 = scalar_lea.vmem %s4446_s16, 32 }
  0x22   : > { %3021 = vmatprep.subr.bf16.mxu0 %v3346_v20  ;;  %v3398_v57 = vld [vmem:[%s3844_s14 + $0x14] ss:$24 sps:$4 sm:$0xff]   ;;  %v3390_v0 = vld [vmem:[%s4497_s1 + $0x158] sm:$0xff]   ;;  %v3394_v1 = vld [vmem:[%s4497_s1 + $0x160] sm:$0xff]   ;;  %p3564_p11 = scmp.ne.s32.totalorder %s4446_s16, %s3563_s30 }
  0x23   : > { %3060 = vmatpush3.bf16.msra.mxu1 %v3345_v19  ;;  %v3382_v62 = vld [vmem:[%s4497_s1 + $0x148] sm:$0xff]   ;;  %v3386_v63 = vld [vmem:[%s4497_s1 + $0x150] sm:$0xff]   ;;  %v3399_v5 = vld [vmem:[%s3844_s14 + $0x44] ss:$24 sps:$4 sm:$0xff]  }
  0x24   : > { %3061 = vmatprep.subr.bf16.mxu1 %v3348_v22  ;;  %v3395_v2 = vld [vmem:[%s4497_s1 + $0x168] sm:$0xff]   ;;  %v3401_v6 = vld [vmem:[%s3844_s14 + $0x40] ss:$24 sps:$4 sm:$0xff]   ;;  %v3405_v9 = vld [vmem:[%s3844_s14 + $0xa4] ss:$24 sps:$4 sm:$0xff]   ;;  %p3565_p12 = pnand %p3564_p11, %p3743_p5 }
  0x25   : > { %3022 = vmatpush3.bf16.msra.mxu0 %v3347_v21  ;;  %v990_v3 = vand.u32 %v3395_v2, %v988_v60  ;;  %v3396_v4 = vld [vmem:[%s3844_s14 + $0x10] ss:$24 sps:$4 sm:$0xff]   ;;  %v3402_v7 = vld [vmem:[%s3844_s14 + $0x74] ss:$24 sps:$4 sm:$0xff]   ;;  %v3407_v10 = vld [vmem:[%s3844_s14 + $0xa0] ss:$24 sps:$4 sm:$0xff]  }
  0x26   : > { %3023 = vmatprep.subr.bf16.mxu0 %v3350_v24  ;;  %v3404_v8 = vld [vmem:[%s3844_s14 + $0x70] ss:$24 sps:$4 sm:$0xff]   ;;  %v2792_v12 = vld [vmem:[%s4498_s2] ss:$0 sm:$0xff]  ;;  %s3010_s14 = sshll.u32 %s3726_s29, 5  ;;  %p3566_p13 = pneg %p3565_p12 }
  0x27   : > { %3062 = vmatpush3.bf16.msra.mxu1 %v3349_v23  ;;  %s4451_s17 = scalar_lea.hbm %s4509_s13, %s3010_s14  ;;  %s3633_s29 = smov [#allocation5]  }
  0x28   : > { %3063 = vmatprep.subr.bf16.mxu1 %v3352_v26  ;;  %s3567_s15 = sshll.u32 %s3633_s29, 4  ;;  %s3568_s15 = int_to_ptr.vmem [resolvable:$false] %s3567_s15 }
  0x29   : > { %3024 = vmatpush3.bf16.msra.mxu0 %v3351_v25  ;;  %p3570_p0 = scmp.lt.s32.totalorder %s4446_s16, %s3568_s15 }
  0x2a   : > { %3025 = vmatprep.subr.bf16.mxu0 %v3354_v28 }
  0x2b   : > { %3064 = vmatpush3.bf16.msra.mxu1 %v3353_v27 }
  0x2c   : > { %3065 = vmatprep.subr.bf16.mxu1 %v3356_v30 }
  0x2d   : > { %3026 = vmatpush3.bf16.msra.mxu0 %v3355_v29 }
  0x2e   : > { %1122 = vmatprep.subr.bf16.mxu0 %v3627_v33 }
  0x2f   : > { %3066 = vmatpush3.bf16.msra.mxu1 %v3360_v34 }
  0x30   : > { %1025 = vmatmul.mubr.bf16.vlgmr.msra.gmra.mrb[0].mxu0 %v3357_v31 }
  0x31   : > { %1123 = vmatpush1.bf16.msra.mxu0 %v3364_v37  ;;  %1032 = vmatprep.mubr.bf16.mxu0 %v3371_v40 }
  0x32   : > { %1090 = vmatmul.mubr.bf16.vlgmr.msra.gmra.mrb[0].mxu1 %v3361_v35  ;;  %1124 = vmatprep.subr.bf16.mxu0 %v3627_v33 }
  0x33   : > { %1097 = vmatprep.mubr.bf16.mxu1 %v3375_v43 }
  0x35   : > { %1125 = vmatpush1.bf16.msra.mxu0 %v3365_v38 }
  0x36   : > { %1126 = vmatprep.subr.bf16.mxu0 %v3627_v33 }
  0x38   : > { %1033 = vmatmul.mubr.bf16.gmra.mrb[4].mxu0 %v3373_v41 }
  0x39   : > { %1127 = vmatpush1.bf16.msra.mxu0 %v3366_v39  ;;  %1040 = vmatprep.mubr.bf16.mxu0 %v3379_v45 }
  0x3a   : > { %1128 = vmatprep.subr.bf16.mxu0 %v3627_v33  ;;  %1098 = vmatmul.mubr.bf16.gmra.mrb[4].mxu1 %v3377_v44 }
  0x3b   : > { %1105 = vmatprep.mubr.bf16.mxu1 %v3383_v47 }
  0x3d   : > { %1129 = vmatpush1.bf16.msra.mxu0 %v3367_v42 }
  0x3e   : > { %1130 = vmatprep.subr.bf16.mxu0 %v3627_v33 }
  0x40   : > { %1041 = vmatmul.mubr.bf16.gmra.mrb[8].mxu0 %v3381_v48 }
  0x41   : > { %1131 = vmatpush1.bf16.msra.mxu0 %v3368_v46  ;;  %1048 = vmatprep.mubr.bf16.mxu0 %v3387_v49 }
  0x42   : > { %1132 = vmatprep.subr.bf16.mxu0 %v3627_v33  ;;  %1106 = vmatmul.mubr.bf16.gmra.mrb[8].mxu1 %v3385_v50 }
  0x43   : > { %1113 = vmatprep.mubr.bf16.mxu1 %v3391_v52 }
  0x45   : > { %1133 = vmatpush1.bf16.msra.mxu0 %v3369_v51 }
  0x46   : > { %1134 = vmatprep.subr.bf16.mxu0 %v3627_v33 }
  0x48   : > { %1049 = vmatmul.mubr.bf16.gmra.mrb[12].mxu0 %v3389_v54 }
  0x49   : > { %1135 = vmatpush1.bf16.msra.mxu0 %v3370_v53  ;;  %2863 = vmatprep.mubr.msk.bf16.mxu0 %vm972_vm2, %v3398_v57 }
  0x4a   : > { %1136 = vmatprep.subr.bf16.mxu0 %v3627_v33  ;;  %1114 = vmatmul.mubr.bf16.gmra.mrb[12].mxu1 %v3393_v58 }
  0x4d   : > { %1137 = vmatpush1.bf16.msra.mxu0 %v3374_v59 }
  0x4e   : > { %1138 = vmatprep.subr.bf16.mxu0 %v3627_v33 }
  0x51   : > { %1139 = vmatpush1.bf16.msra.mxu0 %v3378_v61 }
  0x52   : > { %1140 = vmatprep.subr.bf16.mxu0 %v3627_v33 }
  0x55   : > { %1141 = vmatpush1.bf16.msra.mxu0 %v3382_v62 }
  0x56   : > { %1142 = vmatprep.subr.bf16.mxu0 %v3627_v33 }
  0x59   : > { %1143 = vmatpush1.bf16.msra.mxu0 %v3386_v63 }
  0x5a   : > { %1144 = vmatprep.subr.bf16.mxu0 %v3627_v33 }
  0x5d   : > { %1145 = vmatpush1.bf16.msra.mxu0 %v3390_v0 }
  0x5e   : > { %1146 = vmatprep.subr.bf16.mxu0 %v3627_v33 }
  0x61   : > { %1147 = vmatpush1.bf16.msra.mxu0 %v3394_v1 }
  0x62   : > { %1148 = vmatprep.subr.bf16.mxu0 %v3627_v33 }
  0x65   : > { %1149 = vmatpush1.bf16.msra.mxu0 %v990_v3 }
  0x68   : > { %1155 = vmatmul.mubr.bf16.vlgmr.msra.gmra.mrb[16].mxu0 %v3396_v4 }
  0x69   : > { %2864 = vmatprep.mubr.msk.bf16.mxu0 %vm972_vm2, %v3399_v5 }
  0x70   : > { %1163 = vmatmul.mubr.bf16.gmra.mrb[20].mxu0 %v3401_v6 }
  0x71   : > { %2865 = vmatprep.mubr.msk.bf16.mxu0 %vm972_vm2, %v3402_v7 }
  0x78   : > { %1171 = vmatmul.mubr.bf16.gmra.mrb[24].mxu0 %v3404_v8 }
  0x79   : > { %2866 = vmatprep.mubr.msk.bf16.mxu0 %vm972_vm2, %v3405_v9 }
  0x80   : > { %1179 = vmatmul.mubr.bf16.gmra.mrb[28].mxu0 %v3407_v10 }
 0x103   : > { %v3027_v11 = vpop.f32.mrb[0].mxu0 }
 0x104   : > { %v3028_v13 = vpop.f32.mrb[1].mxu0 }
 0x105   : > { %v3029_v14 = vadd.f32 %v3028_v13, %v3027_v11  ;;  %v3030_v15 = vpop.f32.mrb[2].mxu0  ;;  %v3067_v16 = vpop.f32.mrb[0].mxu1 }
 0x106   : > { %v3031_v17 = vpop.f32.mrb[3].mxu0  ;;  %v3068_v20 = vpop.f32.mrb[1].mxu1 }
 0x107   : > { %v1027_v18 = vadd.f32 %v3029_v14, %v2792_v12  ;;  %v3032_v19 = vadd.f32 %v3031_v17, %v3030_v15  ;;  %v3069_v21 = vadd.f32 %v3068_v20, %v3067_v16  ;;  %v3070_v22 = vpop.f32.mrb[2].mxu1  ;;  %v3408_v17 = vld [vmem:[%s4499_s3 + $0x40] sm:$0xff]  }
 0x108   : > { %v3071_v24 = vpop.f32.mrb[3].mxu1  ;;  %3091 = vmatprep.subr.bf16.mxu1 %v3408_v17 }
 0x109   : > { %v1030_v23 = vadd.f32 %v3032_v19, %v2792_v12  ;;  %v3072_v25 = vadd.f32 %v3071_v24, %v3070_v22  ;;  %v1092_v26 = vadd.f32 %v3069_v21, %v1027_v18  ;;  %v3409_v19 = vld [vmem:[%s4499_s3] sm:$0xff]   ;;  %v3411_v24 = vld [vmem:[%s4499_s3 + $0x8] sm:$0xff]  }
 0x10a   : > { %3092 = vmatpush3.bf16.msra.mxu1 %v3409_v19 }
 0x10b   : > { %v1095_v27 = vadd.f32 %v3072_v25, %v1030_v23  ;;  %v3033_v28 = vpop.f32.mrb[4].mxu0  ;;  %v3410_v23 = vld [vmem:[%s4499_s3 + $0x48] sm:$0xff]  }
 0x10c   : > { %v3034_v29 = vpop.f32.mrb[5].mxu0  ;;  %3093 = vmatprep.subr.bf16.mxu1 %v3410_v23 }
 0x10d   : > { %v3035_v30 = vadd.f32 %v3034_v29, %v3033_v28  ;;  %v3036_v31 = vpop.f32.mrb[6].mxu0  ;;  %v3073_v32 = vpop.f32.mrb[4].mxu1  ;;  %v3412_v29 = vld [vmem:[%s4499_s3 + $0x50] sm:$0xff]  }
 0x10e   : > { %v3037_v34 = vpop.f32.mrb[7].mxu0  ;;  %v3074_v35 = vpop.f32.mrb[5].mxu1  ;;  %3094 = vmatpush3.bf16.msra.mxu1 %v3411_v24 }
 0x10f   : > { %v1035_v36 = vadd.f32 %v3035_v30, %v2792_v12  ;;  %v3038_v37 = vadd.f32 %v3037_v34, %v3036_v31  ;;  %v3075_v38 = vadd.f32 %v3074_v35, %v3073_v32  ;;  %v3076_v39 = vpop.f32.mrb[6].mxu1  ;;  %v3413_v31 = vld [vmem:[%s4499_s3 + $0x10] sm:$0xff]   ;;  %v3630_v32 = vmov 0.0   ;;  %3095 = vmatprep.subr.bf16.mxu1 %v3412_v29 }
 0x110   : > { %v3077_v40 = vpop.f32.mrb[7].mxu1  ;;  %446 = vst [vmem:[#allocation2] sm:$0x1] %v3630_v32  ;;  %447 = vst [vmem:[#allocation2 + $0x10] sm:$0x1] %v3630_v32 }
 0x111   : > { %v1038_v41 = vadd.f32 %v3038_v37, %v2792_v12  ;;  %v3078_v42 = vadd.f32 %v3077_v40, %v3076_v39  ;;  %v1100_v43 = vadd.f32 %v3075_v38, %v1035_v36  ;;  %448 = vst [vmem:[#allocation2 + $0x9] sm:$0x1] %v3630_v32  ;;  %449 = vst [vmem:[#allocation2 + $0x19] sm:$0x1] %v3630_v32  ;;  %v3414_v36 = vld [vmem:[%s4499_s3 + $0x58] sm:$0xff]  }
 0x112   : > { %450 = vst [vmem:[#allocation3] sm:$0x1] %v3630_v32  ;;  %451 = vst [vmem:[#allocation3 + $0x10] sm:$0x1] %v3630_v32  ;;  %3096 = vmatpush3.bf16.msra.mxu1 %v3413_v31  ;;  %v3415_v37 = vld [vmem:[%s4499_s3 + $0x18] sm:$0xff]   ;;  %v3426_v31 = vld [vmem:[%s4499_s3 + $0x90] sm:$0xff]  }
 0x113   : > { %v3039_v44 = vpop.f32.mrb[8].mxu0  ;;  %v3942_v45 = vadd.f32 %v3078_v42, %v1038_v41  ;;  %452 = vst [vmem:[#allocation3 + $0x9] sm:$0x1] %v3630_v32  ;;  %453 = vst [vmem:[#allocation3 + $0x19] sm:$0x1] %v3630_v32  ;;  %3097 = vmatprep.subr.bf16.mxu1 %v3414_v36  ;;  %v3429_v36 = vld [vmem:[%s4499_s3 + $0xa8] sm:$0xff]  }
 0x114   : > { %v3040_v46 = vpop.f32.mrb[9].mxu0  ;;  %454 = vst [vmem:[#allocation4] sm:$0x1] %v3630_v32  ;;  %455 = vst [vmem:[#allocation4 + $0x8] sm:$0x1] %v3630_v32 }
 0x115   : > { %v3041_v47 = vadd.f32 %v3040_v46, %v3039_v44  ;;  %v3042_v48 = vpop.f32.mrb[10].mxu0  ;;  %v3079_v49 = vpop.f32.mrb[8].mxu1  ;;  %456 = vst [vmem:[#allocation4 + $0x5] sm:$0x1] %v3630_v32  ;;  %457 = vst [vmem:[#allocation4 + $0xd] sm:$0x1] %v3630_v32 }
 0x116   : > { %v3043_v50 = vpop.f32.mrb[11].mxu0  ;;  %v3080_v51 = vpop.f32.mrb[9].mxu1  ;;  %3098 = vmatpush3.bf16.msra.mxu1 %v3415_v37  ;;  %v3416_v44 = vld [vmem:[%s4499_s3 + $0x60] sm:$0xff]   ;;  %v3430_v37 = vld [vmem:[%s4499_s3 + $0xb0] sm:$0xff]  }
 0x117   : > { %v1043_v52 = vadd.f32 %v3041_v47, %v2792_v12  ;;  %v3044_v53 = vadd.f32 %v3043_v50, %v3042_v48  ;;  %v3081_v54 = vadd.f32 %v3080_v51, %v3079_v49  ;;  %v3082_v55 = vpop.f32.mrb[10].mxu1  ;;  %v3417_v46 = vld [vmem:[%s4499_s3 + $0x20] sm:$0xff]   ;;  %3099 = vmatprep.subr.bf16.mxu1 %v3416_v44  ;;  %v3418_v51 = vld [vmem:[%s4499_s3 + $0x68] sm:$0xff]  }
 0x118   : > { %v3083_v56 = vpop.f32.mrb[11].mxu1  ;;  %v3434_v44 = vld [vmem:[%s4501_s5 + $0x80] sm:$0xff]  }
 0x119   : > { %v1046_v57 = vadd.f32 %v3044_v53, %v2792_v12  ;;  %v3084_v58 = vadd.f32 %v3083_v56, %v3082_v55  ;;  %v3944_v59 = vadd.f32 %v3081_v54, %v1043_v52  ;;  %v3419_v52 = vld [vmem:[%s4499_s3 + $0x28] sm:$0xff]  }
 0x11a   : > { %3100 = vmatpush3.bf16.msra.mxu1 %v3417_v46  ;;  %v3437_v46 = vld [vmem:[%s4501_s5 + $0x88] sm:$0xff]  }
 0x11b   : > { %v3045_v60 = vpop.f32.mrb[12].mxu0  ;;  %v3946_v61 = vadd.f32 %v3084_v58, %v1046_v57  ;;  %3101 = vmatprep.subr.bf16.mxu1 %v3418_v51  ;;  %v3420_v57 = vld [vmem:[%s4499_s3 + $0x70] sm:$0xff]   ;;  %v3441_v51 = vld [vmem:[%s4501_s5 + $0x58] sm:$0xff]  }
 0x11c   : > { %v3046_v62 = vpop.f32.mrb[13].mxu0 }
 0x11d   : > { %v3047_v63 = vadd.f32 %v3046_v62, %v3045_v60  ;;  %v3048_v0 = vpop.f32.mrb[14].mxu0  ;;  %v3085_v1 = vpop.f32.mrb[12].mxu1  ;;  %v3422_v60 = vld [vmem:[%s4499_s3 + $0x78] sm:$0xff]  }
 0x11e   : > { %v3049_v2 = vpop.f32.mrb[15].mxu0  ;;  %v3086_v3 = vpop.f32.mrb[13].mxu1  ;;  %3102 = vmatpush3.bf16.msra.mxu1 %v3419_v52  ;;  %v3443_v52 = vld [vmem:[%s4501_s5 + $0x98] sm:$0xff]  }
 0x11f   : > { %v1051_v4 = vadd.f32 %v3047_v63, %v2792_v12  ;;  %v3050_v5 = vadd.f32 %v3049_v2, %v3048_v0  ;;  %v3087_v6 = vadd.f32 %v3086_v3, %v3085_v1  ;;  %v3088_v7 = vpop.f32.mrb[14].mxu1  ;;  %3103 = vmatprep.subr.bf16.mxu1 %v3420_v57  ;;  %v3423_v63 = vld [vmem:[%s4499_s3 + $0x38] sm:$0xff]   ;;  %v1195_v3 = vlaneseq  ;;  %v3447_v57 = vld [vmem:[%s4501_s5 + $0x68] sm:$0xff]  }
 0x120   : > { %v3089_v8 = vpop.f32.mrb[15].mxu1 }
 0x121   : > { %v1054_v9 = vadd.f32 %v3050_v5, %v2792_v12  ;;  %v3090_v10 = vadd.f32 %v3089_v8, %v3088_v7  ;;  %v3948_v11 = vadd.f32 %v3087_v6, %v1051_v4  ;;  %v1196_v4 = vand.u32 127, %v1195_v3 }
 0x123   : > { %v3950_v13 = vadd.f32 %v3090_v10, %v1054_v9  ;;  %vm1203_vm3 = vcmp.ge.s32.totalorder %v1196_v4, 16 }
 0x13b   : > { %v1156_v14 = vpop.f32.mrb[16].mxu0 }
 0x13c   : > { %v1157_v15 = vadd.f32 %v1156_v14, %v1092_v26  ;;  %v1158_v16 = vpop.f32.mrb[17].mxu0 }
 0x13d   : > { %v1159_v18 = vpop.f32.mrb[18].mxu0 }
 0x13e   : > { %v1160_v20 = vadd.f32 %v1159_v18, %v1095_v27  ;;  %v1161_v21 = vpop.f32.mrb[19].mxu0  ;;  %v1187_v12 = vmax.f32 %v1157_v15, 0.0 }
 0x140   : > { %v1188_v22 = vmax.f32 %v1160_v20, 0.0 }
 0x142   : > { %v3964_v25 = vmax.f32 %v1187_v12, %v1188_v22  ;;  %1199 = vrot.lane.b32.xlu1 %v1188_v22, %s4513_s27 }
 0x143   : > { %v1164_v26 = vpop.f32.mrb[20].mxu0 }
 0x144   : > { %v1165_v27 = vadd.f32 %v1164_v26, %v1100_v43  ;;  %v1166_v28 = vpop.f32.mrb[21].mxu0 }
 0x145   : > { %v1167_v30 = vpop.f32.mrb[22].mxu0  ;;  %v3424_v28 = vld [vmem:[%s4499_s3 + $0x80] sm:$0xff]  }
 0x146   : > { %v1168_v34 = vadd.f32 %v1167_v30, %v3942_v45  ;;  %v1169_v35 = vpop.f32.mrb[23].mxu0  ;;  %v1189_v38 = vmax.f32 %v1165_v27, 0.0  ;;  %v3425_v30 = vld [vmem:[%s4499_s3 + $0x88] sm:$0xff]  }
 0x147   : > { %v3428_v35 = vld [vmem:[%s4499_s3 + $0xa0] sm:$0xff]  }
 0x148   : > { %v1190_v39 = vmax.f32 %v1168_v34, 0.0  ;;  %v3427_v34 = vld [vmem:[%s4499_s3 + $0x98] sm:$0xff]  }
 0x14a   : > { %v1208_v40 = vmax.f32 %v1189_v38, %v1190_v39  ;;  %1210 = vrot.lane.b32.xlu0 %v1190_v39, %s4513_s27  ;;  %v3431_v38 = vld [vmem:[%s4499_s3 + $0xb8] sm:$0xff]  }
 0x14b   : > { %v1172_v41 = vpop.f32.mrb[24].mxu0 }
 0x14c   : > { %v1173_v42 = vadd.f32 %v1172_v41, %v3944_v59  ;;  %v1174_v43 = vpop.f32.mrb[25].mxu0  ;;  %v3421_v59 = vld [vmem:[%s4499_s3 + $0x30] sm:$0xff]  }
 0x14d   : > { %v1175_v45 = vpop.f32.mrb[26].mxu0  ;;  %3104 = vmatpush3.bf16.msra.mxu1 %v3421_v59  ;;  %v3433_v43 = vld [vmem:[%s4501_s5] sm:$0xff]   ;;  %v3449_v59 = vld [vmem:[%s4501_s5 + $0xa8] sm:$0xff]  }
 0x14e   : > { %v1176_v47 = vadd.f32 %v1175_v45, %v3946_v61  ;;  %v1177_v48 = vpop.f32.mrb[27].mxu0  ;;  %v1191_v49 = vmax.f32 %v1173_v42, 0.0  ;;  %3105 = vmatprep.subr.bf16.mxu1 %v3422_v60  ;;  %v3432_v42 = vld [vmem:[%s4501_s5 + $0x40] sm:$0xff]   ;;  %v3435_v45 = vld [vmem:[%s4501_s5 + $0x48] sm:$0xff]   ;;  %v3450_v60 = vld [vmem:[%s4501_s5 + $0x70] sm:$0xff]  }
 0x14f   : > { %3122 = vmatprep.subr.bf16.mxu0 %v3432_v42  ;;  %v3438_v48 = vld [vmem:[%s4501_s5 + $0x50] sm:$0xff]  }
 0x150   : > { %v1192_v50 = vmax.f32 %v1176_v47, 0.0  ;;  %3123 = vmatpush3.bf16.msra.mxu0 %v3433_v43  ;;  %v3436_v47 = vld [vmem:[%s4501_s5 + $0x8] sm:$0xff]   ;;  %v3471_v42 = vld [vmem:[%s4503_s7 + $0x50] ss:$8 sps:$4 sm:$0xff]  }
 0x151   : > { %3106 = vmatpush3.bf16.msra.mxu1 %v3423_v63  ;;  %3124 = vmatprep.subr.bf16.mxu0 %v3435_v45  ;;  %v3453_v63 = vld [vmem:[%s4501_s5 + $0x78] sm:$0xff]   ;;  %v3476_v43 = vld [vmem:[%s4503_s7 + $0x64] ss:$8 sps:$4 sm:$0xff]  }
 0x152   : > { %v1198_v53 = vmax.f32 %v1191_v49, %v1192_v50  ;;  %1201 = vrot.lane.b32.xlu1 %v1192_v50, %s4513_s27  ;;  %3193 = vmatprep.subr.bf16.mxu1 %v3630_v32  ;;  %v3440_v49 = vld [vmem:[%s4501_s5 + $0x90] sm:$0xff]  }
 0x153   : > { %v1180_v54 = vpop.f32.mrb[28].mxu0  ;;  %v3439_v50 = vld [vmem:[%s4501_s5 + $0x10] sm:$0xff]  }
 0x154   : > { %v1181_v55 = vadd.f32 %v1180_v54, %v3948_v11  ;;  %v1182_v56 = vpop.f32.mrb[29].mxu0  ;;  %3125 = vmatpush3.bf16.msra.mxu0 %v3436_v47  ;;  %v3444_v54 = vld [vmem:[%s4501_s5 + $0x60] sm:$0xff]   ;;  %v3479_v45 = vld [vmem:[%s4503_s7 + $0x74] ss:$8 sps:$4 sm:$0xff]  }
 0x155   : > { %v1183_v58 = vpop.f32.mrb[30].mxu0  ;;  %3126 = vmatprep.subr.bf16.mxu0 %v3438_v48  ;;  %v3446_v56 = vld [vmem:[%s4501_s5 + $0xa0] sm:$0xff]  }
 0x156   : > { %v1184_v61 = vadd.f32 %v1183_v58, %v3950_v13  ;;  %v1185_v62 = vpop.f32.mrb[31].mxu0  ;;  %v1193_v0 = vmax.f32 %v1181_v55, 0.0  ;;  %v3445_v55 = vld [vmem:[%s4501_s5 + $0x20] sm:$0xff]   ;;  %v3448_v58 = vld [vmem:[%s4501_s5 + $0x28] sm:$0xff]  }
 0x157   : > { %v3452_v62 = vld [vmem:[%s4501_s5 + $0xb0] sm:$0xff]   ;;  %v3482_v47 = vld [vmem:[%s4503_s7 + $0x84] ss:$8 sps:$4 sm:$0xff]   ;;  %v3480_v48 = vld [vmem:[%s4503_s7 + $0x80] ss:$8 sps:$4 sm:$0xff]  }
 0x158   : > { %v1194_v1 = vmax.f32 %v1184_v61, 0.0  ;;  %3127 = vmatpush3.bf16.msra.mxu0 %v3439_v50  ;;  %v3451_v61 = vld [vmem:[%s4501_s5 + $0x30] sm:$0xff]  }
 0x159   : > { %3128 = vmatprep.subr.bf16.mxu0 %v3441_v51  ;;  %v3483_v50 = vld [vmem:[%s4503_s7 + $0x90] ss:$8 sps:$4 sm:$0xff]   ;;  %v3488_v51 = vld [vmem:[%s4503_s7 + $0xa4] ss:$8 sps:$4 sm:$0xff]  }
 0x15a   : > { %v1209_v2 = vmax.f32 %v1193_v0, %v1194_v1  ;;  %1212 = vrot.lane.b32.xlu0 %v1194_v1, %s4513_s27  ;;  %v3454_v0 = vld [vmem:[%s4501_s5 + $0x38] sm:$0xff]   ;;  %s3569_s27 = scalar_lea.vmem %s3568_s15, 64 }
 0x15b   : > { %v3455_v1 = vld [vmem:[%s4501_s5 + $0xb8] sm:$0xff]   ;;  %p3571_p1 = scmp.lt.s32.totalorder %s3569_s27, %s3563_s30 }
 0x15d   : > { %p3572_p2 = por %p3571_p1, %p3570_p0 }
 0x15f   : > { %p3573_p3 = pnand %p3572_p2, %p3566_p13 }
 0x1b4   : > { %v1200_v5 = vpop.permute.xlu1 %1199 }
 0x1b5   : > { %v1204_v6 = vsel %vm1203_vm3, %v1200_v5, 0.0 }
 0x1b6   : > { %v1206_v9 = vmax.f32 %v3964_v25, %v1204_v6 }
 0x1bc   : > { %v1211_v7 = vpop.permute.xlu0 %1210 }
 0x1bd   : > { %v1214_v8 = vsel %vm1203_vm3, %v1211_v7, 0.0 }
 0x1be   : > { %v1216_v10 = vmax.f32 %v1208_v40, %v1214_v8 }
 0x1c0   : > { %v1218_v11 = vmax.f32 %v1206_v9, %v1216_v10  ;;  %v1222_v13 = vrot.slane %v1216_v10, 7  ;;  %v2867_v10 = vld [vmem:[%s4500_s4] ss:$0 sm:$0xff] }
 0x1c2   : > { %v1227_v14 = vsel %vm1226_vm4, 0.0, %v1222_v13 }
 0x1c3   : > { %v4028_v15 = vmax.f32 %v1218_v11, %v1227_v14 }
 0x1c4   : > { %v1202_v16 = vpop.permute.xlu1 %1201 }
 0x1c5   : > { %1231 = vst [vmem:[#allocation2 + $0x1] sm:$0xff] %v4028_v15  ;;  %v1205_v17 = vsel %vm1203_vm3, %v1202_v16, 0.0 }
 0x1c6   : > { %v1207_v20 = vmax.f32 %v1198_v53, %v1205_v17  ;;  %v3442_v53 = vld [vmem:[%s4501_s5 + $0x18] sm:$0xff]  }
 0x1c7   : > { %3129 = vmatpush3.bf16.msra.mxu0 %v3442_v53  ;;  %v3491_v53 = vld [vmem:[%s4503_s7 + $0xb4] ss:$8 sps:$4 sm:$0xff]  }
 0x1c8   : > { %3130 = vmatprep.subr.bf16.mxu0 %v3444_v54  ;;  %v3489_v54 = vld [vmem:[%s4503_s7 + $0xb0] ss:$8 sps:$4 sm:$0xff]  }
 0x1cb   : > { %3131 = vmatpush3.bf16.msra.mxu0 %v3445_v55  ;;  %v3494_v55 = vld [vmem:[%s4503_s7 + $0xc4] ss:$8 sps:$4 sm:$0xff]  }
 0x1cc   : > { %v1213_v18 = vpop.permute.xlu0 %1212  ;;  %v1233_v26 = vld [vmem:[#allocation2] sm:$0xff]  ;;  %3132 = vmatprep.subr.bf16.mxu0 %v3447_v57  ;;  %v3497_v57 = vld [vmem:[%s4503_s7 + $0xd4] ss:$8 sps:$4 sm:$0xff]  }
 0x1cd   : > { %v1215_v19 = vsel %vm1203_vm3, %v1213_v18, 0.0  ;;  %v1237_v40 = vld [vmem:[#allocation2 + $0x2] sm:$0xff] }
 0x1ce   : > { %v1217_v21 = vmax.f32 %v1209_v2, %v1215_v19  ;;  %v3458_v2 = vld [vmem:[%s4503_s7 + $0x4] ss:$8 sps:$4 sm:$0xff]  }
 0x1cf   : > { %3133 = vmatpush3.bf16.msra.mxu0 %v3448_v58  ;;  %v3495_v58 = vld [vmem:[%s4503_s7 + $0xd0] ss:$8 sps:$4 sm:$0xff]  }
 0x1d0   : > { %v1219_v12 = vmax.f32 %v1207_v20, %v1217_v21  ;;  %v1223_v22 = vrot.slane %v1217_v21, 7  ;;  %3134 = vmatprep.subr.bf16.mxu0 %v3450_v60  ;;  %v3498_v60 = vld [vmem:[%s4503_s7 + $0xe0] ss:$8 sps:$4 sm:$0xff]  }
 0x1d2   : > { %v1228_v23 = vsel %vm1226_vm4, 0.0, %v1223_v22 }
 0x1d3   : > { %v4033_v24 = vmax.f32 %v1219_v12, %v1228_v23  ;;  %3135 = vmatpush3.bf16.msra.mxu0 %v3451_v61  ;;  %v3503_v61 = vld [vmem:[%s4503_s7 + $0xf4] ss:$8 sps:$4 sm:$0xff]  }
 0x1d4   : > { %3136 = vmatprep.subr.bf16.mxu0 %v3453_v63  ;;  %v3506_v63 = vld [vmem:[%s4503_s7 + $0x104] ss:$8 sps:$4 sm:$0xff]  }
 0x1d5   : > { %1232 = vst [vmem:[#allocation2 + $0x11] sm:$0xff] %v4033_v24  ;;  %v1240_v25 = vpack.c.bf16 %v4033_v24, %v4028_v15 }
 0x1d7   : > { %1473 = vmatprep.mubr.bf16.mxu1 %v1240_v25  ;;  %3137 = vmatpush3.bf16.msra.mxu0 %v3454_v0  ;;  %v3456_v25 = vld [vmem:[%s4503_s7] ss:$8 sps:$4 sm:$0xff]  }
 0x1d8   : > { %2151 = vmatprep.subr.bf16.mxu0 %v3458_v2  ;;  %v3528_v0 = vld [vmem:[%s4505_s9 + $0x40] sm:$0xff]   ;;  %v3530_v2 = vld [vmem:[%s4505_s9 + $0x48] sm:$0xff]  }
 0x1dc   : > { %v1234_v27 = vld [vmem:[#allocation2 + $0x10] sm:$0xff] }
 0x1dd   : > { %v1239_v29 = vpack.c.bf16 %v1234_v27, %v1233_v26  ;;  %v1238_v39 = vld [vmem:[#allocation2 + $0x12] sm:$0xff] }
 0x1de   : > { %v1241_v41 = vpack.c.bf16 %v1238_v39, %v1237_v40  ;;  %v3470_v39 = vld [vmem:[%s4503_s7 + $0x44] ss:$8 sps:$4 sm:$0xff]   ;;  %v3468_v40 = vld [vmem:[%s4503_s7 + $0x40] ss:$8 sps:$4 sm:$0xff]  }
 0x1df   : > { %1474 = vmatmul.mubr.bf16.vlgmr.msra.gmra.mrb[16].mxu1 %v1239_v29 }
 0x1e0   : > { %3194 = vmatpush3.bf16.msra.mxu1 %v3424_v28  ;;  %3209 = vmatprep.mubr.msk.bf16.mxu1 %vm3631_vm5, %v3630_v32 }
 0x1e1   : > { %3195 = vmatprep.subr.bf16.mxu1 %v3630_v32 }
 0x1e4   : > { %3196 = vmatpush3.bf16.msra.mxu1 %v3425_v30 }
 0x1e5   : > { %3197 = vmatprep.subr.bf16.mxu1 %v3630_v32 }
 0x1e8   : > { %3198 = vmatpush3.bf16.msra.mxu1 %v3426_v31  ;;  %v3461_v31 = vld [vmem:[%s4503_s7 + $0x14] ss:$8 sps:$4 sm:$0xff]  }
 0x1e9   : > { %3199 = vmatprep.subr.bf16.mxu1 %v3630_v32 }
 0x1ec   : > { %3200 = vmatpush3.bf16.msra.mxu1 %v3427_v34  ;;  %v3459_v34 = vld [vmem:[%s4503_s7 + $0x10] ss:$8 sps:$4 sm:$0xff]  }
 0x1ed   : > { %3201 = vmatprep.subr.bf16.mxu1 %v3630_v32 }
 0x1f0   : > { %3202 = vmatpush3.bf16.msra.mxu1 %v3428_v35  ;;  %v3464_v35 = vld [vmem:[%s4503_s7 + $0x24] ss:$8 sps:$4 sm:$0xff]  }
 0x1f1   : > { %3203 = vmatprep.subr.bf16.mxu1 %v3630_v32 }
 0x1f4   : > { %3204 = vmatpush3.bf16.msra.mxu1 %v3429_v36  ;;  %v3462_v36 = vld [vmem:[%s4503_s7 + $0x20] ss:$8 sps:$4 sm:$0xff]  }
 0x1f5   : > { %3205 = vmatprep.subr.bf16.mxu1 %v3630_v32 }
 0x1f8   : > { %3206 = vmatpush3.bf16.msra.mxu1 %v3430_v37  ;;  %v3467_v37 = vld [vmem:[%s4503_s7 + $0x34] ss:$8 sps:$4 sm:$0xff]  }
 0x1f9   : > { %3207 = vmatprep.subr.bf16.mxu1 %v3630_v32 }
 0x1fc   : > { %3208 = vmatpush3.bf16.msra.mxu1 %v3431_v38  ;;  %v3465_v38 = vld [vmem:[%s4503_s7 + $0x30] ss:$8 sps:$4 sm:$0xff]  }
 0x1fd   : > { %3213 = vmatprep.subr.bf16.mxu1 %v3630_v32 }
 0x1ff   : > { %3210 = vmatmul.mubr.bf16.vlgmr.msra.gmra.mrb[20].mxu1 %v1241_v41  ;;  %v3473_v41 = vld [vmem:[%s4503_s7 + $0x54] ss:$8 sps:$4 sm:$0xff]  }
 0x200   : > { %3229 = vmatprep.mubr.msk.bf16.mxu1 %vm3631_vm5, %v3630_v32  ;;  %3214 = vmatpush3.bf16.msra.mxu1 %v3434_v44  ;;  %v3474_v44 = vld [vmem:[%s4503_s7 + $0x60] ss:$8 sps:$4 sm:$0xff]  }
 0x201   : > { %3215 = vmatprep.subr.bf16.mxu1 %v3630_v32 }
 0x204   : > { %3216 = vmatpush3.bf16.msra.mxu1 %v3437_v46  ;;  %v3477_v46 = vld [vmem:[%s4503_s7 + $0x70] ss:$8 sps:$4 sm:$0xff]  }
 0x205   : > { %3217 = vmatprep.subr.bf16.mxu1 %v3630_v32 }
 0x208   : > { %3218 = vmatpush3.bf16.msra.mxu1 %v3440_v49  ;;  %v3485_v49 = vld [vmem:[%s4503_s7 + $0x94] ss:$8 sps:$4 sm:$0xff]  }
 0x209   : > { %3219 = vmatprep.subr.bf16.mxu1 %v3630_v32 }
 0x20c   : > { %3220 = vmatpush3.bf16.msra.mxu1 %v3443_v52  ;;  %v3486_v52 = vld [vmem:[%s4503_s7 + $0xa0] ss:$8 sps:$4 sm:$0xff]  }
 0x20d   : > { %3221 = vmatprep.subr.bf16.mxu1 %v3630_v32 }
 0x210   : > { %3222 = vmatpush3.bf16.msra.mxu1 %v3446_v56  ;;  %v3492_v56 = vld [vmem:[%s4503_s7 + $0xc0] ss:$8 sps:$4 sm:$0xff]  }
 0x211   : > { %3223 = vmatprep.subr.bf16.mxu1 %v3630_v32 }
 0x214   : > { %3224 = vmatpush3.bf16.msra.mxu1 %v3449_v59  ;;  %v3500_v59 = vld [vmem:[%s4503_s7 + $0xe4] ss:$8 sps:$4 sm:$0xff]  }
 0x215   : > { %3225 = vmatprep.subr.bf16.mxu1 %v3630_v32 }
 0x218   : > { %3226 = vmatpush3.bf16.msra.mxu1 %v3452_v62  ;;  %v3501_v62 = vld [vmem:[%s4503_s7 + $0xf0] ss:$8 sps:$4 sm:$0xff]  }
 0x219   : > { %3227 = vmatprep.subr.bf16.mxu1 %v3630_v32 }
 0x21c   : > { %3228 = vmatpush3.bf16.msra.mxu1 %v3455_v1  ;;  %v3529_v1 = vld [vmem:[%s4505_s9] sm:$0xff]  }
 0x21d   : > { %3153 = vmatprep.subr.bf16.mxu1 %v3528_v0  ;;  %v4356_v0 = vshrl.u32 %v1195_v3, 7 }
 0x2b2   : > { %v3107_v4 = vpop.f32.mrb[16].mxu1 }
 0x2b3   : > { %v3108_v5 = vpop.f32.mrb[17].mxu1 }
 0x2b4   : > { %v3109_v6 = vadd.f32 %v3108_v5, %v3107_v4  ;;  %v3110_v7 = vpop.f32.mrb[18].mxu1  ;;  %v3531_v4 = vld [vmem:[%s4505_s9 + $0x8] sm:$0xff]   ;;  %v3532_v5 = vld [vmem:[%s4505_s9 + $0x50] sm:$0xff]  }
 0x2b5   : > { %v3111_v8 = vpop.f32.mrb[19].mxu1 }
 0x2b6   : > { %v3112_v9 = vadd.f32 %v3111_v8, %v3110_v7  ;;  %v1476_v11 = vadd.f32 %v3109_v6, %v2867_v10  ;;  %v3533_v6 = vld [vmem:[%s4505_s9 + $0x10] sm:$0xff]   ;;  %v3534_v7 = vld [vmem:[%s4505_s9 + $0x58] sm:$0xff]  }
 0x2b8   : > { %v1479_v17 = vadd.f32 %v3112_v9, %v2867_v10 }
 0x2d2   : > { %v1516_v13 = vpop.f32.mrb[20].mxu1 }
 0x2d3   : > { %v1517_v14 = vadd.f32 %v1516_v13, %v1476_v11  ;;  %v3211_v16 = vpop.f32.mrb[21].mxu1  ;;  %v2892_v11 = vld [vmem:[%s4502_s6] ss:$0 sm:$0xff] }
 0x2d4   : > { %v1519_v18 = vpop.f32.mrb[22].mxu1 }
 0x2d5   : > { %v1523_v19 = vmax.f32 %v1517_v14, 0.0  ;;  %v1520_v20 = vadd.f32 %v1519_v18, %v1479_v17  ;;  %v3212_v21 = vpop.f32.mrb[23].mxu1 }
 0x2d7   : > { %1525 = vst [vmem:[#allocation3 + $0x1] sm:$0xff] %v1523_v19  ;;  %v1524_v12 = vmax.f32 %v1520_v20, 0.0 }
 0x2d9   : > { %1526 = vst [vmem:[#allocation3 + $0x11] sm:$0xff] %v1524_v12  ;;  %v1534_v22 = vpack.c.bf16 %v1524_v12, %v1523_v19 }
 0x2db   : > { %1767 = vmatprep.mubr.bf16.mxu0 %v1534_v22 }
 0x2de   : > { %v1531_v23 = vld [vmem:[#allocation3 + $0x2] sm:$0xff] }
 0x2df   : > { %v1527_v27 = vld [vmem:[#allocation3] sm:$0xff] }
 0x2e0   : > { %v1532_v26 = vld [vmem:[#allocation3 + $0x12] sm:$0xff] }
 0x2e1   : > { %v1528_v28 = vld [vmem:[#allocation3 + $0x10] sm:$0xff]  ;;  %v1535_v29 = vpack.c.bf16 %v1532_v26, %v1531_v23 }
 0x2e2   : > { %v1533_v30 = vpack.c.bf16 %v1528_v28, %v1527_v27 }
 0x2e3   : > { %3230 = vmatmul.mubr.bf16.vlgmr.msra.gmra.mrb[24].mxu1 %v1535_v29 }
 0x2e4   : > { %1768 = vmatmul.mubr.bf16.vlgmr.msra.gmra.mrb[32].mxu0 %v1533_v30  ;;  %3154 = vmatpush3.bf16.msra.mxu1 %v3529_v1  ;;  %v1903_v1 = vsub.s32 0, %v4356_v0 }
 0x2e5   : > { %2152 = vmatpush1.bf16.msra.mxu0 %v3456_v25  ;;  %3155 = vmatprep.subr.bf16.mxu1 %v3530_v2  ;;  %v4362_v2 = vld [vmem:[%s4504_s8] sm:$0x3] }
 0x2e6   : > { %2153 = vmatprep.subr.bf16.mxu0 %v3461_v31 }
 0x2e8   : > { %3156 = vmatpush3.bf16.msra.mxu1 %v3531_v4  ;;  %v1904_v4 = vrot.slane %v4362_v2, %v1903_v1 }
 0x2e9   : > { %2154 = vmatpush1.bf16.msra.mxu0 %v3459_v34  ;;  %3157 = vmatprep.subr.bf16.mxu1 %v3532_v5 }
 0x2ea   : > { %2155 = vmatprep.subr.bf16.mxu0 %v3464_v35 }
 0x2ec   : > { %3158 = vmatpush3.bf16.msra.mxu1 %v3533_v6 }
 0x2ed   : > { %2156 = vmatpush1.bf16.msra.mxu0 %v3462_v36  ;;  %3159 = vmatprep.subr.bf16.mxu1 %v3534_v7 }
 0x2ee   : > { %2157 = vmatprep.subr.bf16.mxu0 %v3467_v37 }
 0x2f1   : > { %2158 = vmatpush1.bf16.msra.mxu0 %v3465_v38  ;;  %v3504_v38 = vld [vmem:[%s4503_s7 + $0x100] ss:$8 sps:$4 sm:$0xff]  }
 0x2f2   : > { %2159 = vmatprep.subr.bf16.mxu0 %v3470_v39 }
 0x2f5   : > { %2160 = vmatpush1.bf16.msra.mxu0 %v3468_v40  ;;  %v3512_v40 = vld [vmem:[%s4503_s7 + $0x124] ss:$8 sps:$4 sm:$0xff]  }
 0x2f6   : > { %2161 = vmatprep.subr.bf16.mxu0 %v3473_v41  ;;  %v3510_v41 = vld [vmem:[%s4503_s7 + $0x120] ss:$8 sps:$4 sm:$0xff]  }
 0x2f9   : > { %2162 = vmatpush1.bf16.msra.mxu0 %v3471_v42  ;;  %v3515_v42 = vld [vmem:[%s4503_s7 + $0x134] ss:$8 sps:$4 sm:$0xff]  }
 0x2fa   : > { %2163 = vmatprep.subr.bf16.mxu0 %v3476_v43  ;;  %v3518_v43 = vld [vmem:[%s4503_s7 + $0x144] ss:$8 sps:$4 sm:$0xff]  }
 0x2fd   : > { %2164 = vmatpush1.bf16.msra.mxu0 %v3474_v44  ;;  %v3516_v44 = vld [vmem:[%s4503_s7 + $0x140] ss:$8 sps:$4 sm:$0xff]  }
 0x2fe   : > { %2165 = vmatprep.subr.bf16.mxu0 %v3479_v45  ;;  %v3521_v45 = vld [vmem:[%s4503_s7 + $0x154] ss:$8 sps:$4 sm:$0xff]  }
 0x301   : > { %2166 = vmatpush1.bf16.msra.mxu0 %v3477_v46  ;;  %v3519_v46 = vld [vmem:[%s4503_s7 + $0x150] ss:$8 sps:$4 sm:$0xff]  }
 0x302   : > { %2167 = vmatprep.subr.bf16.mxu0 %v3482_v47  ;;  %v3524_v47 = vld [vmem:[%s4503_s7 + $0x164] ss:$8 sps:$4 sm:$0xff]  }
 0x305   : > { %2168 = vmatpush1.bf16.msra.mxu0 %v3480_v48  ;;  %v3522_v48 = vld [vmem:[%s4503_s7 + $0x160] ss:$8 sps:$4 sm:$0xff]  }
 0x306   : > { %2169 = vmatprep.subr.bf16.mxu0 %v3485_v49  ;;  %v3527_v49 = vld [vmem:[%s4503_s7 + $0x174] ss:$8 sps:$4 sm:$0xff]  }
 0x309   : > { %2170 = vmatpush1.bf16.msra.mxu0 %v3483_v50 }
 0x30a   : > { %2171 = vmatprep.subr.bf16.mxu0 %v3488_v51  ;;  %v3525_v51 = vld [vmem:[%s4503_s7 + $0x170] ss:$8 sps:$4 sm:$0xff]  }
 0x30d   : > { %2172 = vmatpush1.bf16.msra.mxu0 %v3486_v52 }
 0x30e   : > { %2173 = vmatprep.subr.bf16.mxu0 %v3491_v53 }
 0x311   : > { %2174 = vmatpush1.bf16.msra.mxu0 %v3489_v54 }
 0x312   : > { %2175 = vmatprep.subr.bf16.mxu0 %v3494_v55  ;;  %v3535_v55 = vld [vmem:[%s4505_s9 + $0x18] sm:$0xff]  }
 0x313   : > { %3160 = vmatpush3.bf16.msra.mxu1 %v3535_v55 }
 0x315   : > { %2176 = vmatpush1.bf16.msra.mxu0 %v3492_v56  ;;  %v3536_v56 = vld [vmem:[%s4505_s9 + $0x60] sm:$0xff]  }
 0x316   : > { %2177 = vmatprep.subr.bf16.mxu0 %v3497_v57  ;;  %v3537_v57 = vld [vmem:[%s4505_s9 + $0x20] sm:$0xff]   ;;  %3161 = vmatprep.subr.bf16.mxu1 %v3536_v56 }
 0x317   : > { %3162 = vmatpush3.bf16.msra.mxu1 %v3537_v57 }
 0x319   : > { %2178 = vmatpush1.bf16.msra.mxu0 %v3495_v58  ;;  %v3538_v58 = vld [vmem:[%s4505_s9 + $0x68] sm:$0xff]  }
 0x31a   : > { %2179 = vmatprep.subr.bf16.mxu0 %v3500_v59  ;;  %v3539_v59 = vld [vmem:[%s4505_s9 + $0x28] sm:$0xff]   ;;  %3163 = vmatprep.subr.bf16.mxu1 %v3538_v58 }
 0x31b   : > { %3164 = vmatpush3.bf16.msra.mxu1 %v3539_v59 }
 0x31d   : > { %2180 = vmatpush1.bf16.msra.mxu0 %v3498_v60  ;;  %v3540_v60 = vld [vmem:[%s4505_s9 + $0x70] sm:$0xff]  }
 0x31e   : > { %2181 = vmatprep.subr.bf16.mxu0 %v3503_v61  ;;  %v3541_v61 = vld [vmem:[%s4505_s9 + $0x30] sm:$0xff]   ;;  %3165 = vmatprep.subr.bf16.mxu1 %v3540_v60 }
 0x31f   : > { %3166 = vmatpush3.bf16.msra.mxu1 %v3541_v61 }
 0x321   : > { %2182 = vmatpush1.bf16.msra.mxu0 %v3501_v62  ;;  %v3542_v62 = vld [vmem:[%s4505_s9 + $0x78] sm:$0xff]  }
 0x322   : > { %2192 = vmatprep.subr.bf16.mxu0 %v3506_v63  ;;  %v3543_v63 = vld [vmem:[%s4505_s9 + $0x38] sm:$0xff]   ;;  %3167 = vmatprep.subr.bf16.mxu1 %v3542_v62 }
 0x323   : > { %3168 = vmatpush3.bf16.msra.mxu1 %v3543_v63 }
 0x324   : > { %3233 = vmatprep.subr.bf16.mxu1 %v3630_v32 }
 0x3b6   : > { %v1810_v8 = vpop.f32.mrb[24].mxu1 }
 0x3b7   : > { %v3138_v9 = vpop.f32.mrb[32].mxu0  ;;  %v3231_v10 = vpop.f32.mrb[25].mxu1 }
 0x3b8   : > { %v3139_v13 = vpop.f32.mrb[33].mxu0  ;;  %v1813_v16 = vpop.f32.mrb[26].mxu1 }
 0x3b9   : > { %v3140_v14 = vadd.f32 %v3139_v13, %v3138_v9  ;;  %v3141_v17 = vpop.f32.mrb[34].mxu0  ;;  %v3232_v18 = vpop.f32.mrb[27].mxu1 }
 0x3ba   : > { %v3142_v19 = vpop.f32.mrb[35].mxu0  ;;  %v3547_v18 = vld [vmem:[%s4505_s9 + $0x88] sm:$0xff]  }
 0x3bb   : > { %v1770_v20 = vadd.f32 %v3140_v14, %v2892_v11  ;;  %v3143_v21 = vadd.f32 %v3142_v19, %v3141_v17  ;;  %v3548_v19 = vld [vmem:[%s4505_s9 + $0x90] sm:$0xff]  }
 0x3bd   : > { %v1811_v12 = vadd.f32 %v1810_v8, %v1770_v20  ;;  %v1773_v22 = vadd.f32 %v3143_v21, %v2892_v11  ;;  %v3549_v20 = vld [vmem:[%s4505_s9 + $0x98] sm:$0xff]   ;;  %v3550_v21 = vld [vmem:[%s4505_s9 + $0xa0] sm:$0xff]  }
 0x3bf   : > { %v1817_v23 = vadd.f32 %v1811_v12, %v4028_v15  ;;  %v1814_v25 = vadd.f32 %v1813_v16, %v1773_v22  ;;  %v3509_v15 = vld [vmem:[%s4503_s7 + $0x114] ss:$8 sps:$4 sm:$0xff]   ;;  %v3546_v16 = vld [vmem:[%s4505_s9 + $0x80] sm:$0xff]   ;;  %v3551_v12 = vld [vmem:[%s4505_s9 + $0xa8] sm:$0xff]  }
 0x3c0   : > { %v3552_v22 = vld [vmem:[%s4505_s9 + $0xb0] sm:$0xff]  }
 0x3c1   : > { %v1819_v26 = vmax.f32 %v1817_v23, 0.0  ;;  %v1818_v27 = vadd.f32 %v1814_v25, %v4033_v24  ;;  %v3507_v24 = vld [vmem:[%s4503_s7 + $0x110] ss:$8 sps:$4 sm:$0xff]  }
 0x3c2   : > { %v3553_v23 = vld [vmem:[%s4505_s9 + $0xb8] sm:$0xff]  }
 0x3c3   : > { %1821 = vst [vmem:[#allocation2 + $0x1] sm:$0xff] %v1819_v26  ;;  %v1820_v28 = vmax.f32 %v1818_v27, 0.0  ;;  %v3555_v27 = vld [vmem:[%s4507_s11] sm:$0xff]  }
 0x3c5   : > { %1822 = vst [vmem:[#allocation2 + $0x11] sm:$0xff] %v1820_v28  ;;  %v3556_v28 = vld [vmem:[%s4507_s11 + $0x8] sm:$0xff]  }
 0x3ca   : > { %v1827_v29 = vld [vmem:[#allocation2 + $0x1] ss:$2 sm:$0xf]  ;;  %v1823_v30 = vld [vmem:[#allocation2] ss:$2 sm:$0xf] }
 0x3cb   : > { %v1831_v52 = vld [vmem:[#allocation2 + $0x2] ss:$2 sm:$0xf] }
 0x3cc   : > { %v1829_v31 = vld [vmem:[#allocation2 + $0x11] ss:$2 sm:$0xf]  ;;  %v1825_v34 = vld [vmem:[#allocation2 + $0x10] ss:$2 sm:$0xf] }
 0x3cd   : > { %v2918_v35 = vcombine.low %v1827_v29, %v1829_v31  ;;  %v2917_v36 = vcombine.low %v1823_v30, %v1825_v34  ;;  %v1833_v50 = vld [vmem:[#allocation2 + $0x12] ss:$2 sm:$0xf]  ;;  %v3559_v31 = vld [vmem:[%s4507_s11 + $0x20] sm:$0xff]   ;;  %v3560_v34 = vld [vmem:[%s4507_s11 + $0x28] sm:$0xff]  }
 0x3ce   : > { %v1844_v53 = vcombine.low %v1831_v52, %v1833_v50  ;;  %v3557_v29 = vld [vmem:[%s4507_s11 + $0x10] sm:$0xff]   ;;  %v3558_v30 = vld [vmem:[%s4507_s11 + $0x18] sm:$0xff]  }
 0x3cf   : > { %v1849_v37 = vpack.c.bf16 %v2918_v35, %v2918_v35  ;;  %v1848_v39 = vpack.c.bf16 %v2917_v36, %v2917_v36  ;;  %v3561_v35 = vld [vmem:[%s4507_s11 + $0x30] sm:$0xff]   ;;  %v3562_v36 = vld [vmem:[%s4507_s11 + $0x38] sm:$0xff]  }
 0x3d0   : > { %v1850_v54 = vpack.c.bf16 %v1844_v53, %v1844_v53 }
 0x3d1   : > { %2183 = vmatprep.mubr.bf16.mxu0 %v1849_v37 }
 0x3d2   : > { %2184 = vmatmul.mubr.bf16.vlgmr.msra.gmra.mrb[36].mxu0 %v1848_v39 }
 0x3d3   : > { %2193 = vmatpush1.bf16.msra.mxu0 %v3504_v38  ;;  %2224 = vmatprep.mubr.bf16.mxu0 %v3627_v33  ;;  %v3513_v33 = vld [vmem:[%s4503_s7 + $0x130] ss:$8 sps:$4 sm:$0xff]  }
 0x3d4   : > { %2194 = vmatprep.subr.bf16.mxu0 %v3509_v15 }
 0x3d7   : > { %2195 = vmatpush1.bf16.msra.mxu0 %v3507_v24 }
 0x3d8   : > { %2196 = vmatprep.subr.bf16.mxu0 %v3512_v40  ;;  %v1907_v40 = vsub.s32 1, %v4356_v0 }
 0x3db   : > { %2197 = vmatpush1.bf16.msra.mxu0 %v3510_v41  ;;  %v2969_v41 = vld [vmem:[%s4506_s10] ss:$0 sm:$0xff] }
 0x3dc   : > { %2198 = vmatprep.subr.bf16.mxu0 %v3515_v42  ;;  %v1908_v42 = vrot.slane %v4362_v2, %v1907_v40 }
 0x3df   : > { %2199 = vmatpush1.bf16.msra.mxu0 %v3513_v33 }
 0x3e0   : > { %2200 = vmatprep.subr.bf16.mxu0 %v3518_v43 }
 0x3e3   : > { %2201 = vmatpush1.bf16.msra.mxu0 %v3516_v44 }
 0x3e4   : > { %2202 = vmatprep.subr.bf16.mxu0 %v3521_v45 }
 0x3e7   : > { %2203 = vmatpush1.bf16.msra.mxu0 %v3519_v46 }
 0x3e8   : > { %2204 = vmatprep.subr.bf16.mxu0 %v3524_v47 }
 0x3eb   : > { %2205 = vmatpush1.bf16.msra.mxu0 %v3522_v48 }
 0x3ec   : > { %2206 = vmatprep.subr.bf16.mxu0 %v3527_v49 }
 0x3ef   : > { %2207 = vmatpush1.bf16.msra.mxu0 %v3525_v51 }
 0x3f2   : > { %2225 = vmatmul.mubr.bf16.vlgmr.msra.gmra.mrb[36].mxu0 %v1850_v54 }
 0x4c5   : > { %v2226_v5 = vpop.f32.mrb[36].mxu0 }
 0x4c6   : > { %v3273_v6 = vadd.f32 %v2226_v5, %v1904_v4  ;;  %v4365_v7 = vpop.f32.mrb[37].mxu0 }
 0x4c7   : > { %v2230_v8 = vpop.f32.mrb[38].mxu0  ;;  %v3274_v44 = vadd.f32 %v4365_v7, %v1908_v42 }
 0x4c8   : > { %v2233_v9 = vmax.f32 %v3273_v6, 0.0  ;;  %v2231_v10 = vpop.f32.mrb[39].mxu0 }
 0x4ca   : > { %v2235_v11 = vcombine.high %v2233_v9, %v2233_v9  ;;  %2237 = vst [vmem:[#allocation4 + $0x1] sm:$0xf] %v2233_v9  ;;  %v3632_v9 = vmov 1966171168  }
 0x4cb   : > { %v2684_v10 = vunpack.c.l.s4 %v3632_v9 }
 0x4cc   : > { %2238 = vst [vmem:[#allocation4 + $0x9] sm:$0xf] %v2235_v11 }
 0x4cd   : > { %v2685_v11 = vunpack.c.0.s8 %v2684_v10 }
 0x4d3   : > { %v3544_v3 = vld [vmem:[#allocation4 + $0x1] ss:$8 sps:$4 sm:$0xff]  }
 0x4d4   : > { %v3545_v13 = vld [vmem:[#allocation4] ss:$8 sps:$4 sm:$0xff]   ;;  %v2260_v14 = vpack.c.bf16 %v3544_v3, %v3544_v3 }
 0x4d5   : > { %v2259_v17 = vpack.c.bf16 %v3545_v13, %v3545_v13  ;;  %v3554_v25 = vld [vmem:[#allocation4 + $0x2] ss:$8 sps:$4 sm:$0xff]   ;;  %v2994_v3 = vld [vmem:[%s4508_s12] ss:$0 sm:$0xff]  ;;  %v2688_v13 = vsub.s32 %v2685_v11, %v4356_v0 }
 0x4d6   : > { %2493 = vmatprep.mubr.bf16.mxu1 %v2260_v14  ;;  %v2261_v26 = vpack.c.bf16 %v3554_v25, %v3554_v25 }
 0x4d7   : > { %2494 = vmatmul.mubr.bf16.vlgmr.msra.gmra.mrb[28].mxu1 %v2259_v17 }
 0x4d8   : > { %3234 = vmatpush3.bf16.msra.mxu1 %v3546_v16  ;;  %3249 = vmatprep.mubr.msk.bf16.mxu1 %vm3631_vm5, %v3630_v32 }
 0x4d9   : > { %3235 = vmatprep.subr.bf16.mxu1 %v3630_v32 }
 0x4dc   : > { %3236 = vmatpush3.bf16.msra.mxu1 %v3547_v18 }
 0x4dd   : > { %3237 = vmatprep.subr.bf16.mxu1 %v3630_v32 }
 0x4e0   : > { %3238 = vmatpush3.bf16.msra.mxu1 %v3548_v19 }
 0x4e1   : > { %3239 = vmatprep.subr.bf16.mxu1 %v3630_v32 }
 0x4e4   : > { %3240 = vmatpush3.bf16.msra.mxu1 %v3549_v20 }
 0x4e5   : > { %3241 = vmatprep.subr.bf16.mxu1 %v3630_v32 }
 0x4e8   : > { %3242 = vmatpush3.bf16.msra.mxu1 %v3550_v21 }
 0x4e9   : > { %3243 = vmatprep.subr.bf16.mxu1 %v3630_v32 }
 0x4ec   : > { %3244 = vmatpush3.bf16.msra.mxu1 %v3551_v12 }
 0x4ed   : > { %3245 = vmatprep.subr.bf16.mxu1 %v3630_v32 }
 0x4f0   : > { %3246 = vmatpush3.bf16.msra.mxu1 %v3552_v22 }
 0x4f1   : > { %3247 = vmatprep.subr.bf16.mxu1 %v3630_v32 }
 0x4f4   : > { %3248 = vmatpush3.bf16.msra.mxu1 %v3553_v23 }
 0x4f5   : > { %3253 = vmatprep.subr.bf16.mxu1 %v3630_v32 }
 0x4f7   : > { %3250 = vmatmul.mubr.bf16.vlgmr.msra.gmra.mrb[32].mxu1 %v2261_v26 }
 0x4f8   : > { %3269 = vmatprep.mubr.msk.bf16.mxu1 %vm3631_vm5, %v3630_v32  ;;  %3254 = vmatpush3.bf16.msra.mxu1 %v3555_v27 }
 0x4f9   : > { %3255 = vmatprep.subr.bf16.mxu1 %v3630_v32 }
 0x4fc   : > { %3256 = vmatpush3.bf16.msra.mxu1 %v3556_v28 }
 0x4fd   : > { %3257 = vmatprep.subr.bf16.mxu1 %v3630_v32 }
 0x500   : > { %3258 = vmatpush3.bf16.msra.mxu1 %v3557_v29 }
 0x501   : > { %3259 = vmatprep.subr.bf16.mxu1 %v3630_v32 }
 0x504   : > { %3260 = vmatpush3.bf16.msra.mxu1 %v3558_v30 }
 0x505   : > { %3261 = vmatprep.subr.bf16.mxu1 %v3630_v32 }
 0x508   : > { %3262 = vmatpush3.bf16.msra.mxu1 %v3559_v31 }
 0x509   : > { %3263 = vmatprep.subr.bf16.mxu1 %v3630_v32 }
 0x50c   : > { %3264 = vmatpush3.bf16.msra.mxu1 %v3560_v34 }
 0x50d   : > { %3265 = vmatprep.subr.bf16.mxu1 %v3630_v32 }
 0x510   : > { %3266 = vmatpush3.bf16.msra.mxu1 %v3561_v35 }
 0x511   : > { %3267 = vmatprep.subr.bf16.mxu1 %v3630_v32 }
 0x514   : > { %3268 = vmatpush3.bf16.msra.mxu1 %v3562_v36 }
 0x5aa   : > { %v3169_v37 = vpop.f32.mrb[28].mxu1 }
 0x5ab   : > { %v3170_v38 = vpop.f32.mrb[29].mxu1 }
 0x5ac   : > { %v3171_v39 = vadd.f32 %v3170_v38, %v3169_v37  ;;  %v3172_v15 = vpop.f32.mrb[30].mxu1 }
 0x5ad   : > { %v3173_v24 = vpop.f32.mrb[31].mxu1 }
 0x5ae   : > { %v2496_v33 = vadd.f32 %v3171_v39, %v2969_v41 }
 0x5ca   : > { %v2535_v43 = vpop.f32.mrb[32].mxu1 }
 0x5cb   : > { %v2536_v45 = vadd.f32 %v2535_v43, %v2496_v33  ;;  %v3251_v32 = vpop.f32.mrb[33].mxu1 }
 0x5cc   : > { %v2538_v46 = vpop.f32.mrb[34].mxu1 }
 0x5cd   : > { %v2541_v47 = vadd.f32 %v3274_v44, %v2536_v45  ;;  %v3252_v48 = vpop.f32.mrb[35].mxu1 }
 0x5cf   : > { %v2542_v49 = vmax.f32 %v2541_v47, 0.0 }
 0x5d1   : > { %v2544_v50 = vcombine.high %v2542_v49, %v2542_v49  ;;  %v2547_v51 = vsel %vm2546_vm6, %v2542_v49, 0.0 }
 0x5d2   : > { %v2548_v52 = vrot.slane %v2547_v51, 4 }
 0x5d3   : > { %v2554_v53 = vsel %vm2546_vm6, %v2544_v50, 0.0 }
 0x5d4   : > { %v2549_v54 = vadd.f32 %v2548_v52, %v2547_v51  ;;  %v2555_v55 = vrot.slane %v2554_v53, 4 }
 0x5d6   : > { %v2550_v56 = vrot.slane %v2549_v54, 2  ;;  %v2556_v57 = vadd.f32 %v2555_v55, %v2554_v53 }
 0x5d8   : > { %v2551_v58 = vadd.f32 %v2550_v56, %v2549_v54  ;;  %v2557_v59 = vrot.slane %v2556_v57, 2 }
 0x5da   : > { %v2552_v60 = vrot.slane %v2551_v58, 1  ;;  %v2558_v61 = vadd.f32 %v2557_v59, %v2556_v57 }
 0x5dc   : > { %v2553_v62 = vadd.f32 %v2552_v60, %v2551_v58  ;;  %v2559_v63 = vrot.slane %v2558_v61, 1 }
 0x5de   : > { %v2560_v1 = vadd.f32 %v2559_v63, %v2558_v61  ;;  %v2561_v2 = vpack.c.bf16 %v2553_v62, %v2553_v62 }
 0x5e0   : > { %v2562_v4 = vpack.c.bf16 %v2560_v1, %v2560_v1  ;;  %v2588_v5 = vunpack.c.l.b16 %v2561_v2 }
 0x5e2   : > { %v2589_v6 = vunpack.c.l.b16 %v2562_v4 }
 0x5e4   : > { %v2591_v7 = vsel %vm2590_vm7, %v2589_v6, %v2588_v5 }
 0x5e5   : > { %v2592_v8 = vpack.c.b16 %v2591_v7, %v2591_v7 }
 0x5e7   : > { %3270 = vmatmul.mubr.bf16.vlgmr.msra.gmra.mrb[36].mxu1 %v2592_v8 }
 0x6ba   : > { %v2676_v14 = vpop.f32.mrb[36].mxu1 }
 0x6bb   : > { %v2677_v16 = vadd.f32 %v2994_v3, %v2676_v14  ;;  %v3271_v17 = vpop.f32.mrb[37].mxu1 }
 0x6bc   : > { %v2679_v18 = vpop.f32.mrb[38].mxu1 }
 0x6bd   : > { %v2689_v19 = vrot.slane %v2677_v16, %v2688_v13  ;;  %v3272_v20 = vpop.f32.mrb[39].mxu1 }
 0x6bf   : > { %v2690_v21 = vcombine.high %v2689_v19, %v2689_v19  ;;  %3003 = vst.sshfl [vmem:[%s436_s23] sm:$0x1 pattern:$0x73625140] %v2689_v19 }
 0x6c1   : > { %3004 = vst.sshfl [vmem:[%s436_s23 + $0x1] sm:$0x1 pattern:$0x73625140] %v2690_v21 }
 0x6c2   : > { %3576 = shalt.err (!%p3573_p3)
}
 0x6c3   : > { %s3577_s22 = scalar_lea.hbm %s4451_s17, 32  ;;  %s3581_s20 = scalar_lea.hbm %s4509_s13, 64 }
 0x6c4   : > { %p3578_p4 = scmp.ne.s32.totalorder %s4451_s17, %s3577_s22  ;;  %p3582_p9 = scmp.lt.u32.totalorder %s4451_s17, %s4509_s13 }
 0x6c5   : > { %p3583_p10 = scmp.lt.u32.totalorder %s3581_s20, %s3577_s22  ;;  %p3585_p12 = scmp.lt.u32.totalorder %s3577_s22, %s4451_s17 }
 0x6c6   : > { %p3579_p7 = pnand %p3578_p4, %p3743_p5 }
 0x6c7   : > { %p3584_p11 = por %p3583_p10, %p3582_p9 }
 0x6c8   : > { %p3580_p8 = pneg %p3579_p7 }
 0x6c9   : > { %p3586_p13 = por %p3585_p12, %p3584_p11 }
 0x6cb   : > { %p3587_p0 = pnand %p3586_p13, %p3580_p8 }
 0x6cd   : > { %3590 = shalt.err (!%p3587_p0)
}
 0x6ce   : > { %s3634_s27 = smov 1   ;;  %s4519_s30 = smov 16  }
 0x6cf   : > { %3280 = dma.vmem_to_hbm [thread:$0]  (%p3743_p5), %s4446_s16, 32, %s4451_s17, %s4453_s24, %s4519_s30, %s4519_s30, %s3634_s27  }
 0x6d0 PF: > { %p3286_p1 = scmp.ge.s32.totalorder %s3625_s28, 2  ;;  %s2738_s15 = sand.u32 1, %s3613_s25  }
 0x6d1   : > { %s2739_s22 = scalar_lea.sflag [#allocation6], %s2738_s15 }
 0x6d2   : > { %p3283_p2 = pnand %p3286_p1, %p3747_p6 }
 0x6d4   : > { %3608 = dma.done.wait (!%p3283_p2), %s2739_s22, 32  }
 0x6d5   : > { %3610 = vsyncadd (!%p3283_p2), %s2739_s22, 4294967264  ;;  %s4520_s28 = sld [smem:[#allocation9_spill]]  ;;  %s4521_s18 = sld [smem:[#allocation8_spill]] }
 0x6d6   : > { %s4522_s27 = sld [smem:[#allocation10_spill]]  ;;  %s4523_s25 = smov %s3617_s26 }
 0x6db   : > { %p23_p3 = scmp.ge.s32.totalorder %s4520_s28, 4   ;;  %s4524_s26 = smov %s4521_s18 }
 0x6dd   :  { %25 = sbr.rel (!%p23_p3) target bundleno = 3 (0x3), region = 112 }
 0x6e4   :  { %2744 = vsyncpa [#allocation6], 1 }
 0x6e5   :  { %2746 = vsyncpa [#allocation6 + $0x1], 1 }

</bundles_post_ra>
